<compile_context>
chip_gen: v7x
topology: tpu7x:2x2x1
jax: 0.10.0
libtpu: 0.0.40
codegen_flags: <defaults>
</compile_context>

<pallas_src>
import jax
import jax.numpy as jnp
from jax.experimental import pallas as pl
from jax.experimental.pallas import tpu as pltpu

MODALITIES = 5            # 5 modalities * 8 channels = 40 = SpatialAttn channel_size
FEAT_C = 8                # per-modality feature channels (8 * 46 = 368 -> ConfidenceLayer)
FEAT_T = 46               # time steps (TemporalAttn time_step_size)
N_CLASSES = 2
BATCH = 4
HIDDEN = MODALITIES * FEAT_C * FEAT_T   # 1840 ('sum' fusion)

VMEM_SPEC = pl.BlockSpec(memory_space=pltpu.MemorySpace.VMEM)

# column layout of the packed (8,128) "small" input buffer
COL_ONEHOT = 0                              # rows 0:B,  cols 0:N
COL_CONF_B = COL_ONEHOT + N_CLASSES         # rows 0:N,  cols 2:7
COL_TMP_B = COL_CONF_B + MODALITIES         # rows 0:1,  cols 7:53
COL_SP_B = COL_TMP_B + FEAT_T               # rows 0:M,  cols 53:61
COL_MS_B = COL_SP_B + FEAT_C                # rows 0:1,  cols 61:63

# column layout of the packed (B,128) output buffer
OUT_SAMPLE = 0                              # SAMPLE_conf, one per row
OUT_PROB = 1                                # MS probabilities, cols 1:1+N
OUT_LOSS = OUT_PROB + N_CLASSES             # scalar Loss (replicated down rows)
OUT_LANES = 128


# ---------------------------------------------------------------------------
# Single fused kernel: confidence heads -> scaling -> attention -> fusion ->
#                      classifier -> losses, all scalars packed lane-dense.
# ---------------------------------------------------------------------------
def _net_kernel(feat_ref, small_ref, cls_w_ref, tmp_w_ref, spw_bd_ref, out_ref):
    f32 = jnp.float32
    bf16 = jnp.bfloat16

    feats = feat_ref[...]                                 # (B, M, C, T) f32
    B, M, C, T = feats.shape
    N = N_CLASSES

    small = small_ref[...]                                # (8, 128) packed scalars
    onehot = small[0:B, COL_ONEHOT:COL_ONEHOT + N]        # (B, N)
    conf_b = small[0:N, COL_CONF_B:COL_CONF_B + M]        # (N, M)
    tmp_b = small[0:1, COL_TMP_B:COL_TMP_B + T]           # (1, T)
    sp_b = small[0:M, COL_SP_B:COL_SP_B + C]              # (M, C)
    ms_b = small[0:1, COL_MS_B:COL_MS_B + N]              # (1, N)

    cls_w = cls_w_ref[...]                                # (2N, M, C, T) f32

    # ---- per-modality confidence heads: Linear(C*T -> 2) as VPU multiply-reduce
    #      done in 2D (B, M) shapes (no (...,1,1) keepdims temporaries).
    l0 = jnp.sum(jnp.sum(feats * cls_w[0], axis=3), axis=2) + conf_b[0:1]   # (B, M)
    l1 = jnp.sum(jnp.sum(feats * cls_w[1], axis=3), axis=2) + conf_b[1:2]   # (B, M)

    # postprocessor == 'msp': max softmax probability per modality (exact div,
    # these feed both the confidence loss and SAMPLE_conf).
    lmax = jnp.maximum(l0, l1)
    e0 = jnp.exp(l0 - lmax)
    e1 = jnp.exp(l1 - lmax)
    denom = e0 + e1
    p0 = e0 / denom                                       # (B, M)
    p1 = e1 / denom
    conf = jnp.maximum(p0, p1)                            # (B, M)

    # SAMPLE_conf = mean over modalities (before scaling), kept as a column
    sample_col = jnp.mean(conf, axis=1, keepdims=True)    # (B, 1)

    # scaling == 'softmax' over modalities
    cmax = jnp.max(conf, axis=1, keepdims=True)
    cexp = jnp.exp(conf - cmax)
    scale = cexp / jnp.sum(cexp, axis=1, keepdims=True)   # (B, M)

    # ---- confidence-weighted features; modality concat == channel blocks of 8
    wf4 = feats * scale[:, :, None, None]                 # (B, M, C, T)
    wf2 = wf4.reshape(B * M * C, T)                       # (B*40, T)
    wf2_bf = wf2.astype(bf16)                             # single cast, shared by both dots

    # ---- TemporalAttn: relu(Linear_T->T(wf)) gating — one bf16 2D MXU matmul
    at2 = jnp.dot(wf2_bf, tmp_w_ref[...], preferred_element_type=f32) + tmp_b
    at4 = jnp.maximum(at2, 0.0).reshape(B, M, C, T)

    # ---- SpatialAttn: block-diagonal (over batch) weight -> one bf16 2D matmul;
    #      softmax over the batch axis reproduces PyTorch's implicit-dim on 3D.
    # TODO(synk): spw_bd is O(B^2) in VMEM; for large batch switch to a per-batch
    # (40,40)@(40,46) formulation or a batch grid (v7x has only 64 MiB VMEM).
    aw2 = jnp.dot(spw_bd_ref[...], wf2_bf, preferred_element_type=f32)      # (B*40, T)
    aw4 = aw2.reshape(B, M, C, T) + sp_b[None, :, :, None]
    amax = jnp.max(aw4, axis=0, keepdims=True)
    aexp = jnp.exp(aw4 - amax)
    aw4 = aexp * pl.reciprocal(jnp.sum(aexp, axis=0, keepdims=True), approx=True)

    # ---- fusion_type == 'sum' folded algebraically: wf*at + wf*aw == wf*(at+aw)
    fused = wf4 * (at4 + aw4)                             # (B, M, C, T)

    # ---- MSclassifier Linear(1840 -> 2) on the VPU -> (B, N)
    v0 = jnp.sum(jnp.sum(jnp.sum(fused * cls_w[N + 0], axis=3), axis=2),
                 axis=1, keepdims=True)                   # (B, 1)
    v1 = jnp.sum(jnp.sum(jnp.sum(fused * cls_w[N + 1], axis=3), axis=2),
                 axis=1, keepdims=True)                   # (B, 1)
    ml = jnp.concatenate([v0, v1], axis=1) + ms_b         # (B, N)

    # MS_logit = softmax over classes (exact division; this is a returned output)
    mmax = jnp.max(ml, axis=1, keepdims=True)
    mexp = jnp.exp(ml - mmax)
    ms_prob = mexp / jnp.sum(mexp, axis=1, keepdims=True)  # (B, N)

    # ---- losses: CrossEntropy applied to already-softmaxed probs (as in the ref)
    ms_lse = jnp.log(jnp.sum(jnp.exp(ms_prob), axis=1, keepdims=True))       # (B, 1)
    ms_true = jnp.sum(onehot * ms_prob, axis=1, keepdims=True)               # (B, 1)
    ms_loss = jnp.mean(ms_lse - ms_true, axis=0, keepdims=True)              # (1, 1)

    conf_lse = jnp.log(jnp.exp(p0) + jnp.exp(p1))                            # (B, M)
    conf_true = onehot[:, 0:1] * p0 + onehot[:, 1:2] * p1                    # (B, M)
    conf_ce = conf_lse - conf_true
    conf_loss = jnp.mean(jnp.mean(conf_ce, axis=1, keepdims=True),
                         axis=0, keepdims=True)                              # (1, 1)

    loss_col = jnp.broadcast_to(ms_loss + conf_loss, (B, 1))                 # (B, 1)

    # ---- single lane-dense output row block: [sample | ms_prob | loss | 0-pad]
    pad = jnp.zeros((B, OUT_LANES - (2 + N)), f32)
    out_ref[...] = jnp.concatenate([sample_col, ms_prob, loss_col, pad], axis=1)


# ---------------------------------------------------------------------------
# Parameter init (deterministic, PyTorch nn.Linear-style uniform) with all
# static packing / bf16 casts / block-diagonalization done once, up front.
# ---------------------------------------------------------------------------
def init_params(key, batch=BATCH):
    def u(k, shape, fan_in):
        bound = 1.0 / (float(fan_in) ** 0.5)
        return jax.random.uniform(k, shape, jnp.float32, -bound, bound)

    ks = jax.random.split(key, 8)
    mc = MODALITIES * FEAT_C

    conf_w = u(ks[0], (N_CLASSES, MODALITIES, FEAT_C, FEAT_T), FEAT_C * FEAT_T)
    conf_b = u(ks[1], (N_CLASSES, MODALITIES), FEAT_C * FEAT_T)
    tmp_w = u(ks[2], (FEAT_T, FEAT_T), FEAT_T)            # stored (in, out)
    tmp_b = u(ks[3], (1, FEAT_T), FEAT_T)
    sp_w = u(ks[4], (mc, mc), mc)                         # stored (in, out)
    sp_b = u(ks[5], (MODALITIES, FEAT_C), mc)
    ms_w = u(ks[6], (N_CLASSES, MODALITIES, FEAT_C, FEAT_T), HIDDEN)
    ms_b = u(ks[7], (1, N_CLASSES), HIDDEN)

    # confidence heads + MS classifier share one weight DMA: (2N, M, C, T)
    cls_w = jnp.concatenate([conf_w, ms_w], axis=0)

    # batch-block-diagonal spatial weight: precomputed once, stored bf16.
    spw_bd = jnp.kron(jnp.eye(batch, dtype=jnp.float32), sp_w.T).astype(jnp.bfloat16)

    # all biases (+ a slot for the per-call one-hot label) packed into one
    # lane-dense (8,128) buffer -> a single small input DMA.
    small = jnp.zeros((8, 128), jnp.float32)
    small = small.at[0:N_CLASSES, COL_CONF_B:COL_CONF_B + MODALITIES].set(conf_b)
    small = small.at[0:1, COL_TMP_B:COL_TMP_B + FEAT_T].set(tmp_b)
    small = small.at[0:MODALITIES, COL_SP_B:COL_SP_B + FEAT_C].set(sp_b)
    small = small.at[0:1, COL_MS_B:COL_MS_B + N_CLASSES].set(ms_b)

    return dict(cls_w=cls_w,
                tmp_w=tmp_w.astype(jnp.bfloat16),
                spw_bd=spw_bd,
                small_base=small)


# ---------------------------------------------------------------------------
# Forward: one pallas_call, 5 input DMAs, 1 lane-dense output DMA.
# ---------------------------------------------------------------------------
@jax.jit
def net_forward(feats, label, params):
    """feats: (B, M, C, T) stack of per-modality extracted features."""
    B = feats.shape[0]
    N = N_CLASSES

    onehot = jax.nn.one_hot(label, N, dtype=jnp.float32)             # (B, N)
    small = params['small_base'].at[0:B, COL_ONEHOT:COL_ONEHOT + N].set(onehot)

    out = pl.pallas_call(
        _net_kernel,
        out_shape=jax.ShapeDtypeStruct((B, OUT_LANES), jnp.float32),
        in_specs=[VMEM_SPEC] * 5,
        out_specs=VMEM_SPEC,
    )(feats, small, params['cls_w'], params['tmp_w'], params['spw_bd'])

    sample_conf = out[:, OUT_SAMPLE]                                  # (B,)
    ms_prob = out[:, OUT_PROB:OUT_PROB + N]                           # (B, N)
    loss = out[0, OUT_LOSS]                                           # ()
    return sample_conf, loss, ms_prob


if __name__ == "__main__":
    key = jax.random.PRNGKey(0)
    k_feat, k_label = jax.random.split(key)
    feats = jax.random.normal(k_feat, (BATCH, MODALITIES, FEAT_C, FEAT_T), jnp.float32)
    label = jax.random.randint(k_label, (BATCH,), 0, N_CLASSES, dtype=jnp.int32)
    params = init_params(jax.random.PRNGKey(1), batch=BATCH)

    sample_conf, loss, ms_logit = net_forward(feats, label, params)
    jax.block_until_ready((sample_conf, loss, ms_logit))

    assert sample_conf.shape == (BATCH,)
    assert ms_logit.shape == (BATCH, N_CLASSES)
    assert loss.shape == ()
    assert bool(jnp.isfinite(loss))
    assert bool(jnp.all(jnp.isfinite(ms_logit)))
    print("KERNEL_OK")
</pallas_src>

<mosaic_0001>
module attributes {stable_mosaic.version = 11 : i64} {
  func.func @_net_kernel(%arg0: memref<4x5x8x46xf32, #tpu.memory_space<vmem>>, %arg1: memref<8x128xf32, #tpu.memory_space<vmem>>, %arg2: memref<4x5x8x46xf32, #tpu.memory_space<vmem>>, %arg3: memref<46x46xbf16, #tpu.memory_space<vmem>>, %arg4: memref<160x160xbf16, #tpu.memory_space<vmem>>, %arg5: memref<4x128xf32, #tpu.memory_space<vmem>>) attributes {dimension_semantics = [], scalar_prefetch = 0 : i64, scratch_operands = 0 : i64, tpu.core_type = #tpu.core_type<tc>} {
    %c0 = arith.constant 0 : index
    %c0_0 = arith.constant 0 : index
    %c0_1 = arith.constant 0 : index
    %c0_2 = arith.constant 0 : index
    %0 = vector.load %arg0[%c0, %c0_0, %c0_1, %c0_2] : memref<4x5x8x46xf32, #tpu.memory_space<vmem>>, vector<4x5x8x46xf32>
    %c0_3 = arith.constant 0 : index
    %c0_4 = arith.constant 0 : index
    %1 = vector.load %arg1[%c0_3, %c0_4] : memref<8x128xf32, #tpu.memory_space<vmem>>, vector<8x128xf32>
    %2 = vector.extract_strided_slice %1 {offsets = [0, 0], sizes = [4, 2], strides = [1, 1]} : vector<8x128xf32> to vector<4x2xf32>
    %3 = vector.extract_strided_slice %1 {offsets = [0, 2], sizes = [2, 5], strides = [1, 1]} : vector<8x128xf32> to vector<2x5xf32>
    %4 = vector.extract_strided_slice %1 {offsets = [0, 7], sizes = [1, 46], strides = [1, 1]} : vector<8x128xf32> to vector<1x46xf32>
    %5 = vector.extract_strided_slice %1 {offsets = [0, 53], sizes = [5, 8], strides = [1, 1]} : vector<8x128xf32> to vector<5x8xf32>
    %6 = vector.extract_strided_slice %1 {offsets = [0, 61], sizes = [1, 2], strides = [1, 1]} : vector<8x128xf32> to vector<1x2xf32>
    %c0_5 = arith.constant 0 : index
    %c0_6 = arith.constant 0 : index
    %c0_7 = arith.constant 0 : index
    %c0_8 = arith.constant 0 : index
    %7 = vector.load %arg2[%c0_5, %c0_6, %c0_7, %c0_8] : memref<4x5x8x46xf32, #tpu.memory_space<vmem>>, vector<4x5x8x46xf32>
    %8 = vector.extract_strided_slice %7 {offsets = [0, 0, 0, 0], sizes = [1, 5, 8, 46], strides = [1, 1, 1, 1]} : vector<4x5x8x46xf32> to vector<1x5x8x46xf32>
    %9 = vector.shape_cast %8 : vector<1x5x8x46xf32> to vector<5x8x46xf32>
    %10 = vector.shape_cast %9 : vector<5x8x46xf32> to vector<1x5x8x46xf32>
    %11 = vector.broadcast %10 : vector<1x5x8x46xf32> to vector<4x5x8x46xf32>
    %12 = arith.mulf %0, %11 : vector<4x5x8x46xf32>
    %cst = arith.constant dense<0.000000e+00> : vector<4x5x8xf32>
    %13 = vector.multi_reduction <add>, %12, %cst [3] : vector<4x5x8x46xf32> to vector<4x5x8xf32>
    %cst_9 = arith.constant dense<0.000000e+00> : vector<4x5xf32>
    %14 = vector.multi_reduction <add>, %13, %cst_9 [2] : vector<4x5x8xf32> to vector<4x5xf32>
    %15 = vector.extract_strided_slice %3 {offsets = [0, 0], sizes = [1, 5], strides = [1, 1]} : vector<2x5xf32> to vector<1x5xf32>
    %16 = vector.broadcast %15 : vector<1x5xf32> to vector<4x5xf32>
    %17 = arith.addf %14, %16 : vector<4x5xf32>
    %18 = vector.extract_strided_slice %7 {offsets = [1, 0, 0, 0], sizes = [1, 5, 8, 46], strides = [1, 1, 1, 1]} : vector<4x5x8x46xf32> to vector<1x5x8x46xf32>
    %19 = vector.shape_cast %18 : vector<1x5x8x46xf32> to vector<5x8x46xf32>
    %20 = vector.shape_cast %19 : vector<5x8x46xf32> to vector<1x5x8x46xf32>
    %21 = vector.broadcast %20 : vector<1x5x8x46xf32> to vector<4x5x8x46xf32>
    %22 = arith.mulf %0, %21 : vector<4x5x8x46xf32>
    %cst_10 = arith.constant dense<0.000000e+00> : vector<4x5x8xf32>
    %23 = vector.multi_reduction <add>, %22, %cst_10 [3] : vector<4x5x8x46xf32> to vector<4x5x8xf32>
    %cst_11 = arith.constant dense<0.000000e+00> : vector<4x5xf32>
    %24 = vector.multi_reduction <add>, %23, %cst_11 [2] : vector<4x5x8xf32> to vector<4x5xf32>
    %25 = vector.extract_strided_slice %3 {offsets = [1, 0], sizes = [1, 5], strides = [1, 1]} : vector<2x5xf32> to vector<1x5xf32>
    %26 = vector.broadcast %25 : vector<1x5xf32> to vector<4x5xf32>
    %27 = arith.addf %24, %26 : vector<4x5xf32>
    %28 = arith.maximumf %17, %27 : vector<4x5xf32>
    %29 = arith.subf %17, %28 : vector<4x5xf32>
    %30 = math.exp %29 : vector<4x5xf32>
    %31 = arith.subf %27, %28 : vector<4x5xf32>
    %32 = math.exp %31 : vector<4x5xf32>
    %33 = arith.addf %30, %32 : vector<4x5xf32>
    %34 = arith.divf %30, %33 : vector<4x5xf32>
    %35 = arith.divf %32, %33 : vector<4x5xf32>
    %36 = arith.maximumf %34, %35 : vector<4x5xf32>
    %cst_12 = arith.constant dense<0.000000e+00> : vector<4xf32>
    %37 = vector.multi_reduction <add>, %36, %cst_12 [1] : vector<4x5xf32> to vector<4xf32>
    %38 = vector.shape_cast %37 : vector<4xf32> to vector<4x1xf32>
    %cst_13 = arith.constant 5.000000e+00 : f32
    %39 = vector.broadcast %cst_13 : f32 to vector<4x1xf32>
    %40 = arith.divf %38, %39 : vector<4x1xf32>
    %cst_14 = arith.constant dense<0xFF800000> : vector<4xf32>
    %41 = vector.multi_reduction <maximumf>, %36, %cst_14 [1] : vector<4x5xf32> to vector<4xf32>
    %42 = vector.shape_cast %41 : vector<4xf32> to vector<4x1xf32>
    %43 = vector.broadcast %42 : vector<4x1xf32> to vector<4x5xf32>
    %44 = arith.subf %36, %43 : vector<4x5xf32>
    %45 = math.exp %44 : vector<4x5xf32>
    %cst_15 = arith.constant dense<0.000000e+00> : vector<4xf32>
    %46 = vector.multi_reduction <add>, %45, %cst_15 [1] : vector<4x5xf32> to vector<4xf32>
    %47 = vector.shape_cast %46 : vector<4xf32> to vector<4x1xf32>
    %48 = vector.broadcast %47 : vector<4x1xf32> to vector<4x5xf32>
    %49 = arith.divf %45, %48 : vector<4x5xf32>
    %50 = vector.shape_cast %49 : vector<4x5xf32> to vector<4x5x1x1xf32>
    %51 = vector.broadcast %50 : vector<4x5x1x1xf32> to vector<4x5x8x46xf32>
    %52 = arith.mulf %0, %51 : vector<4x5x8x46xf32>
    %53 = vector.shape_cast %52 : vector<4x5x8x46xf32> to vector<160x46xf32>
    %54 = arith.truncf %53 : vector<160x46xf32> to vector<160x46xbf16>
    %c0_16 = arith.constant 0 : index
    %c0_17 = arith.constant 0 : index
    %55 = vector.load %arg3[%c0_16, %c0_17] : memref<46x46xbf16, #tpu.memory_space<vmem>>, vector<46x46xbf16>
    %cst_18 = arith.constant dense<0.000000e+00> : vector<160x46xf32>
    %56 = tpu.matmul %54, %55, %cst_18 {dimension_numbers = #tpu.dot_dimension_numbers<[1], [0], [0], [1], [0, 0, 1, 1], [], []>} : vector<160x46xbf16>, vector<46x46xbf16>, vector<160x46xf32> -> vector<160x46xf32>
    %57 = vector.broadcast %4 : vector<1x46xf32> to vector<160x46xf32>
    %58 = arith.addf %56, %57 : vector<160x46xf32>
    %cst_19 = arith.constant 0.000000e+00 : f32
    %59 = vector.broadcast %cst_19 : f32 to vector<160x46xf32>
    %60 = arith.maximumf %58, %59 : vector<160x46xf32>
    %61 = vector.shape_cast %60 : vector<160x46xf32> to vector<4x5x8x46xf32>
    %c0_20 = arith.constant 0 : index
    %c0_21 = arith.constant 0 : index
    %62 = vector.load %arg4[%c0_20, %c0_21] : memref<160x160xbf16, #tpu.memory_space<vmem>>, vector<160x160xbf16>
    %cst_22 = arith.constant dense<0.000000e+00> : vector<160x46xf32>
    %63 = tpu.matmul %62, %54, %cst_22 {dimension_numbers = #tpu.dot_dimension_numbers<[1], [0], [0], [1], [0, 0, 1, 1], [], []>} : vector<160x160xbf16>, vector<160x46xbf16>, vector<160x46xf32> -> vector<160x46xf32>
    %64 = vector.shape_cast %63 : vector<160x46xf32> to vector<4x5x8x46xf32>
    %65 = vector.shape_cast %5 : vector<5x8xf32> to vector<1x5x8x1xf32>
    %66 = vector.broadcast %65 : vector<1x5x8x1xf32> to vector<4x5x8x46xf32>
    %67 = arith.addf %64, %66 : vector<4x5x8x46xf32>
    %cst_23 = arith.constant dense<0xFF800000> : vector<5x8x46xf32>
    %68 = vector.multi_reduction <maximumf>, %67, %cst_23 [0] : vector<4x5x8x46xf32> to vector<5x8x46xf32>
    %69 = vector.shape_cast %68 : vector<5x8x46xf32> to vector<1x5x8x46xf32>
    %70 = vector.broadcast %69 : vector<1x5x8x46xf32> to vector<4x5x8x46xf32>
    %71 = arith.subf %67, %70 : vector<4x5x8x46xf32>
    %72 = math.exp %71 : vector<4x5x8x46xf32>
    %cst_24 = arith.constant dense<0.000000e+00> : vector<5x8x46xf32>
    %73 = vector.multi_reduction <add>, %72, %cst_24 [0] : vector<4x5x8x46xf32> to vector<5x8x46xf32>
    %74 = vector.shape_cast %73 : vector<5x8x46xf32> to vector<1x5x8x46xf32>
    %75 = tpu.reciprocal %74 {approx = true} : vector<1x5x8x46xf32> -> vector<1x5x8x46xf32>
    %76 = vector.broadcast %75 : vector<1x5x8x46xf32> to vector<4x5x8x46xf32>
    %77 = arith.mulf %72, %76 : vector<4x5x8x46xf32>
    %78 = arith.addf %61, %77 : vector<4x5x8x46xf32>
    %79 = arith.mulf %52, %78 : vector<4x5x8x46xf32>
    %80 = vector.extract_strided_slice %7 {offsets = [2, 0, 0, 0], sizes = [1, 5, 8, 46], strides = [1, 1, 1, 1]} : vector<4x5x8x46xf32> to vector<1x5x8x46xf32>
    %81 = vector.shape_cast %80 : vector<1x5x8x46xf32> to vector<5x8x46xf32>
    %82 = vector.shape_cast %81 : vector<5x8x46xf32> to vector<1x5x8x46xf32>
    %83 = vector.broadcast %82 : vector<1x5x8x46xf32> to vector<4x5x8x46xf32>
    %84 = arith.mulf %79, %83 : vector<4x5x8x46xf32>
    %cst_25 = arith.constant dense<0.000000e+00> : vector<4x5x8xf32>
    %85 = vector.multi_reduction <add>, %84, %cst_25 [3] : vector<4x5x8x46xf32> to vector<4x5x8xf32>
    %cst_26 = arith.constant dense<0.000000e+00> : vector<4x5xf32>
    %86 = vector.multi_reduction <add>, %85, %cst_26 [2] : vector<4x5x8xf32> to vector<4x5xf32>
    %cst_27 = arith.constant dense<0.000000e+00> : vector<4xf32>
    %87 = vector.multi_reduction <add>, %86, %cst_27 [1] : vector<4x5xf32> to vector<4xf32>
    %88 = vector.shape_cast %87 : vector<4xf32> to vector<4x1xf32>
    %89 = vector.extract_strided_slice %7 {offsets = [3, 0, 0, 0], sizes = [1, 5, 8, 46], strides = [1, 1, 1, 1]} : vector<4x5x8x46xf32> to vector<1x5x8x46xf32>
    %90 = vector.shape_cast %89 : vector<1x5x8x46xf32> to vector<5x8x46xf32>
    %91 = vector.shape_cast %90 : vector<5x8x46xf32> to vector<1x5x8x46xf32>
    %92 = vector.broadcast %91 : vector<1x5x8x46xf32> to vector<4x5x8x46xf32>
    %93 = arith.mulf %79, %92 : vector<4x5x8x46xf32>
    %cst_28 = arith.constant dense<0.000000e+00> : vector<4x5x8xf32>
    %94 = vector.multi_reduction <add>, %93, %cst_28 [3] : vector<4x5x8x46xf32> to vector<4x5x8xf32>
    %cst_29 = arith.constant dense<0.000000e+00> : vector<4x5xf32>
    %95 = vector.multi_reduction <add>, %94, %cst_29 [2] : vector<4x5x8xf32> to vector<4x5xf32>
    %cst_30 = arith.constant dense<0.000000e+00> : vector<4xf32>
    %96 = vector.multi_reduction <add>, %95, %cst_30 [1] : vector<4x5xf32> to vector<4xf32>
    %97 = vector.shape_cast %96 : vector<4xf32> to vector<4x1xf32>
    %98 = tpu.concatenate %88, %97 in 1 : vector<4x1xf32>, vector<4x1xf32> -> vector<4x2xf32>
    %99 = vector.broadcast %6 : vector<1x2xf32> to vector<4x2xf32>
    %100 = arith.addf %98, %99 : vector<4x2xf32>
    %cst_31 = arith.constant dense<0xFF800000> : vector<4xf32>
    %101 = vector.multi_reduction <maximumf>, %100, %cst_31 [1] : vector<4x2xf32> to vector<4xf32>
    %102 = vector.shape_cast %101 : vector<4xf32> to vector<4x1xf32>
    %103 = vector.broadcast %102 : vector<4x1xf32> to vector<4x2xf32>
    %104 = arith.subf %100, %103 : vector<4x2xf32>
    %105 = math.exp %104 : vector<4x2xf32>
    %cst_32 = arith.constant dense<0.000000e+00> : vector<4xf32>
    %106 = vector.multi_reduction <add>, %105, %cst_32 [1] : vector<4x2xf32> to vector<4xf32>
    %107 = vector.shape_cast %106 : vector<4xf32> to vector<4x1xf32>
    %108 = vector.broadcast %107 : vector<4x1xf32> to vector<4x2xf32>
    %109 = arith.divf %105, %108 : vector<4x2xf32>
    %110 = math.exp %109 : vector<4x2xf32>
    %cst_33 = arith.constant dense<0.000000e+00> : vector<4xf32>
    %111 = vector.multi_reduction <add>, %110, %cst_33 [1] : vector<4x2xf32> to vector<4xf32>
    %112 = vector.shape_cast %111 : vector<4xf32> to vector<4x1xf32>
    %113 = math.log %112 : vector<4x1xf32>
    %114 = arith.mulf %2, %109 : vector<4x2xf32>
    %cst_34 = arith.constant dense<0.000000e+00> : vector<4xf32>
    %115 = vector.multi_reduction <add>, %114, %cst_34 [1] : vector<4x2xf32> to vector<4xf32>
    %116 = vector.shape_cast %115 : vector<4xf32> to vector<4x1xf32>
    %117 = arith.subf %113, %116 : vector<4x1xf32>
    %cst_35 = arith.constant dense<0.000000e+00> : vector<1xf32>
    %118 = vector.multi_reduction <add>, %117, %cst_35 [0] : vector<4x1xf32> to vector<1xf32>
    %119 = vector.shape_cast %118 : vector<1xf32> to vector<1x1xf32>
    %cst_36 = arith.constant 4.000000e+00 : f32
    %120 = vector.broadcast %cst_36 : f32 to vector<1x1xf32>
    %121 = arith.divf %119, %120 : vector<1x1xf32>
    %122 = math.exp %34 : vector<4x5xf32>
    %123 = math.exp %35 : vector<4x5xf32>
    %124 = arith.addf %122, %123 : vector<4x5xf32>
    %125 = math.log %124 : vector<4x5xf32>
    %126 = vector.extract_strided_slice %2 {offsets = [0, 0], sizes = [4, 1], strides = [1, 1]} : vector<4x2xf32> to vector<4x1xf32>
    %127 = vector.broadcast %126 : vector<4x1xf32> to vector<4x5xf32>
    %128 = arith.mulf %127, %34 : vector<4x5xf32>
    %129 = vector.extract_strided_slice %2 {offsets = [0, 1], sizes = [4, 1], strides = [1, 1]} : vector<4x2xf32> to vector<4x1xf32>
    %130 = vector.broadcast %129 : vector<4x1xf32> to vector<4x5xf32>
    %131 = arith.mulf %130, %35 : vector<4x5xf32>
    %132 = arith.addf %128, %131 : vector<4x5xf32>
    %133 = arith.subf %125, %132 : vector<4x5xf32>
    %cst_37 = arith.constant dense<0.000000e+00> : vector<4xf32>
    %134 = vector.multi_reduction <add>, %133, %cst_37 [1] : vector<4x5xf32> to vector<4xf32>
    %135 = vector.shape_cast %134 : vector<4xf32> to vector<4x1xf32>
    %cst_38 = arith.constant 5.000000e+00 : f32
    %136 = vector.broadcast %cst_38 : f32 to vector<4x1xf32>
    %137 = arith.divf %135, %136 : vector<4x1xf32>
    %cst_39 = arith.constant dense<0.000000e+00> : vector<1xf32>
    %138 = vector.multi_reduction <add>, %137, %cst_39 [0] : vector<4x1xf32> to vector<1xf32>
    %139 = vector.shape_cast %138 : vector<1xf32> to vector<1x1xf32>
    %cst_40 = arith.constant 4.000000e+00 : f32
    %140 = vector.broadcast %cst_40 : f32 to vector<1x1xf32>
    %141 = arith.divf %139, %140 : vector<1x1xf32>
    %142 = arith.addf %121, %141 : vector<1x1xf32>
    %143 = vector.shape_cast %142 : vector<1x1xf32> to vector<1x1xf32>
    %144 = vector.broadcast %143 : vector<1x1xf32> to vector<4x1xf32>
    %cst_41 = arith.constant 0.000000e+00 : f32
    %145 = vector.broadcast %cst_41 : f32 to vector<4x124xf32>
    %146 = tpu.concatenate %40, %109, %144, %145 in 1 : vector<4x1xf32>, vector<4x2xf32>, vector<4x1xf32>, vector<4x124xf32> -> vector<4x128xf32>
    %c0_42 = arith.constant 0 : index
    %c0_43 = arith.constant 0 : index
    %147 = vector.load %arg5[%c0_42, %c0_43] : memref<4x128xf32, #tpu.memory_space<vmem>>, vector<4x128xf32>
    tpu.vector_store %arg5[%c0_42, %c0_43], %146 {strides = array<i32>} : memref<4x128xf32, #tpu.memory_space<vmem>>, vector<4x128xf32>,
    return
  }
}

</mosaic_0001>

<bundles_post_ra>
// kernel: net_forward.1
= control target key start
LH: loop header
LB: loop body
LE: loop exit
PB: predicated region body
PF: predicated region fallthrough
CT: control target
= control target key end

     0   :  { %10 = vsyncpa [#allocation3], 0  ;;  %s4115_s0 = inlined_call_operand.hbm [shape: f32[4,5,8,46], index: 0, kind: input, shape index: {}]   ;;  %s4116_s1 = inlined_call_operand.vmem [shape: f32[8,128], index: 1, kind: input, shape index: {}]   ;;  %s4117_s2 = inlined_call_operand.hbm [shape: f32[4,5,8,46], index: 2, kind: input, shape index: {}]   ;;  %s4118_s3 = inlined_call_operand.hbm [shape: bf16[46,46], index: 3, kind: input, shape index: {}]   ;;  %s4119_s4 = inlined_call_operand.hbm [shape: bf16[160,160], index: 4, kind: input, shape index: {}]   ;;  %s4120_s5 = inlined_call_operand.vmem [shape: f32[4,128], index: 5, kind: output, shape index: {}]  }
   0x1   :  { %11 = vsyncpa [#allocation5], 0 }
   0x2   :  { %12 = vsyncpa [#allocation8], 0  ;;  %s2934_s18 = smov [#allocation4]   ;;  %s2935_s20 = smov [#allocation2]  }
   0x3   :  { %s32_s19 = sshll.u32 %s2934_s18, 4  ;;  %s18_s21 = sshll.u32 %s2935_s20, 4  ;;  %s33_s19 = int_to_ptr.vmem [resolvable:$true] %s32_s19  ;;  %s2978_s21 = int_to_ptr.vmem [resolvable:$true] %s18_s21 }
   0x4   :  { %s2840_s24 = scalar_lea.hbm %s4117_s2, 2560 }
   0x5   :  { %p2841_p0 = scmp.ne.s32.totalorder %s4117_s2, %s2840_s24  ;;  %p2844_p1 = scmp.lt.u32.totalorder %s2840_s24, %s4117_s2 }
   0x7   :  { %p2846_p2 = pnand %p2844_p1, %p2841_p0 }
   0x9   :  { %2849 = shalt.err (!%p2846_p2)
}
   0xa   :  { %s2850_s29 = scalar_lea.vmem %s33_s19, 2560  ;;  %p2855_p4 = scmp.lt.s32.totalorder %s33_s19, %s33_s19 }
   0xb   :  { %p2851_p3 = scmp.ne.s32.totalorder %s33_s19, %s2850_s29  ;;  %p2856_p5 = scmp.lt.s32.totalorder %s2850_s29, %s2850_s29 }
   0xd   :  { %p2857_p6 = por %p2856_p5, %p2855_p4 }
   0xf   :  { %p2858_p7 = pnand %p2857_p6, %p2851_p3 }
  0x11   :  { %2861 = shalt.err (!%p2858_p7)
}
  0x12   :  { %s2936_s30 = smov 128   ;;  %s2937_s6 = smov 8  }
  0x13   :  { %38 = dma.hbm_to_vmem [thread:$0]  %s4117_s2, 2560, %s33_s19, [#allocation5], %s2936_s30, %s2936_s30, %s2937_s6  }
  0x14   :  { %s2862_s11 = scalar_lea.hbm %s4115_s0, 2560 }
  0x15   :  { %p2863_p8 = scmp.ne.s32.totalorder %s4115_s0, %s2862_s11  ;;  %p2866_p9 = scmp.lt.u32.totalorder %s2862_s11, %s4115_s0 }
  0x17   :  { %p2868_p10 = pnand %p2866_p9, %p2863_p8 }
  0x19   :  { %2871 = shalt.err (!%p2868_p10)
}
  0x1a   :  { %s2872_s16 = scalar_lea.vmem %s2978_s21, 2560  ;;  %p2877_p12 = scmp.lt.s32.totalorder %s2978_s21, %s2978_s21 }
  0x1b   :  { %p2873_p11 = scmp.ne.s32.totalorder %s2978_s21, %s2872_s16  ;;  %p2878_p13 = scmp.lt.s32.totalorder %s2872_s16, %s2872_s16 }
  0x1d   :  { %p2879_p0 = por %p2878_p13, %p2877_p12 }
  0x1f   :  { %p2880_p1 = pnand %p2879_p0, %p2873_p11 }
  0x21   :  { %2883 = shalt.err (!%p2880_p1)
}
  0x22   :  { %24 = dma.hbm_to_vmem [thread:$0]  %s4115_s0, 2560, %s2978_s21, [#allocation3], %s2936_s30, %s2936_s30, %s2937_s6  }
  0x23   :  { %s2938_s18 = smov [#allocation6]   ;;  %s2884_s23 = scalar_lea.hbm %s4118_s3, 384 }
  0x24   :  { %s44_s19 = sshll.u32 %s2938_s18, 4  ;;  %p2885_p2 = scmp.ne.s32.totalorder %s4118_s3, %s2884_s23  ;;  %s45_s19 = int_to_ptr.vmem [resolvable:$true] %s44_s19 }
  0x25   :  { %p2888_p3 = scmp.lt.u32.totalorder %s2884_s23, %s4118_s3 }
  0x27   :  { %p2890_p4 = pnand %p2888_p3, %p2885_p2 }
  0x29   :  { %2893 = shalt.err (!%p2890_p4)
}
  0x2a   :  { %s2894_s28 = scalar_lea.vmem %s45_s19, 384  ;;  %p2899_p6 = scmp.lt.s32.totalorder %s45_s19, %s45_s19 }
  0x2b   :  { %p2895_p5 = scmp.ne.s32.totalorder %s45_s19, %s2894_s28  ;;  %p2900_p7 = scmp.lt.s32.totalorder %s2894_s28, %s2894_s28 }
  0x2d   :  { %p2901_p8 = por %p2900_p7, %p2899_p6 }
  0x2f   :  { %p2902_p9 = pnand %p2901_p8, %p2895_p5 }
  0x31   :  { %2905 = shalt.err (!%p2902_p9)
}
  0x32   :  { %s2939_s0 = smov 64   ;;  %s2940_s21 = smov 4  }
  0x33   :  { %50 = dma.hbm_to_vmem [thread:$0]  %s4118_s3, 384, %s45_s19, [#allocation5], %s2939_s0, %s2939_s0, %s2940_s21  }
  0x34   :  { %s2941_s8 = smov [#allocation7]   ;;  %s2906_s12 = scalar_lea.hbm %s4119_s4, 2560 }
  0x35   :  { %s56_s9 = sshll.u32 %s2941_s8, 4  ;;  %p2907_p10 = scmp.ne.s32.totalorder %s4119_s4, %s2906_s12  ;;  %s57_s9 = int_to_ptr.vmem [resolvable:$true] %s56_s9 }
  0x36   :  { %p2910_p11 = scmp.lt.u32.totalorder %s2906_s12, %s4119_s4 }
  0x38   :  { %p2912_p12 = pnand %p2910_p11, %p2907_p10 }
  0x3a   :  { %2915 = shalt.err (!%p2912_p12)
}
  0x3b   :  { %s2916_s2 = scalar_lea.vmem %s57_s9, 2560  ;;  %p2921_p0 = scmp.lt.s32.totalorder %s57_s9, %s57_s9 }
  0x3c   :  { %p2917_p13 = scmp.ne.s32.totalorder %s57_s9, %s2916_s2  ;;  %p2922_p1 = scmp.lt.s32.totalorder %s2916_s2, %s2916_s2 }
  0x3e   :  { %p2923_p2 = por %p2922_p1, %p2921_p0 }
  0x40   :  { %p2924_p3 = pnand %p2923_p2, %p2917_p13 }
  0x42   :  { %2927 = shalt.err (!%p2924_p3)
}
  0x43   :  { %62 = dma.hbm_to_vmem [thread:$0]  %s4119_s4, 2560, %s57_s9, [#allocation8], %s2936_s30, %s2936_s30, %s2937_s6  }
  0x44   :  { %2928 = dma.done.wait [#allocation3], 2560  }
  0x45   :  { %2929 = vsyncadd [#allocation3], 4294964736 }
  0x46   :  { %2930 = dma.done.wait [#allocation5], 2944  }
  0x47   :  { %2931 = vsyncadd [#allocation5], 4294964352 }
  0x48   :  { %2932 = dma.done.wait [#allocation8], 2560  }
  0x49   :  { %2933 = vsyncadd [#allocation8], 4294964736  ;;  %v81_v0 = vld [vmem:[#allocation2 + $0x28] sm:$0xff]  ;;  %v3042_v1 = vld [vmem:[#allocation4] sm:$0xff]  ;;  %vm137_vm0 = vcmask 375808   ;;  %vm300_vm1 = vcmask 1041409  }
  0x4a   :  { %v76_v2 = vld [vmem:[#allocation2] sm:$0xff]  ;;  %v122_v3 = vmul.f32 %v3042_v1, %v81_v0  ;;  %v82_v5 = vld [vmem:[#allocation2 + $0x30] sm:$0xff]  ;;  %v3046_v6 = vld [vmem:[#allocation4 + $0x8] sm:$0xff]  ;;  %vm302_vm2 = vcmask 1042434   ;;  %vm304_vm3 = vcmask 1043459   ;;  %vm306_vm4 = vcmask 1044484  }
  0x4b   :  { %v117_v4 = vmul.f32 %v3042_v1, %v76_v2  ;;  %v77_v7 = vld [vmem:[#allocation2 + $0x8] sm:$0xff]  ;;  %v123_v8 = vmul.f32 %v3046_v6, %v82_v5  ;;  %v3050_v10 = vld [vmem:[#allocation4 + $0x30] sm:$0xff]  ;;  %v83_v22 = vld [vmem:[#allocation2 + $0x38] sm:$0xff]  ;;  %vm324_vm5 = vcmask 61440   ;;  %vm661_vm6 = vcmask 35840   ;;  %s2944_s6 = smov 121  }
  0x4c   :  { %v118_v9 = vmul.f32 %v3046_v6, %v77_v7  ;;  %v3052_v11 = vld [vmem:[#allocation4 + $0x28] sm:$0xff]  ;;  %v153_v12 = vsel %vm137_vm0, %v122_v3, 0.0  ;;  %v352_v16 = vmul.f32 %v3050_v10, %v77_v7  ;;  %v357_v20 = vmul.f32 %v3050_v10, %v82_v5  ;;  %v3064_v23 = vld [vmem:[#allocation4 + $0x10] sm:$0xff]  ;;  %v87_v25 = vld [vmem:[#allocation2 + $0x58] sm:$0xff]  ;;  %s2945_s18 = smov 67  }
  0x4d   :  { %v138_v13 = vsel %vm137_vm0, %v117_v4, 0.0  ;;  %154 = vadd.xlane.f32.xlu1 %v153_v12  ;;  %v156_v14 = vsel %vm137_vm0, %v123_v8, 0.0  ;;  %v351_v17 = vmul.f32 %v3052_v11, %v76_v2  ;;  %v356_v21 = vmul.f32 %v3052_v11, %v81_v0  ;;  %v78_v24 = vld [vmem:[#allocation2 + $0x10] sm:$0xff]  ;;  %v3070_v31 = vld [vmem:[#allocation4 + $0x38] sm:$0xff]  ;;  %v84_v44 = vld [vmem:[#allocation2 + $0x40] sm:$0xff] }
  0x4e   :  { %139 = vadd.xlane.f32.xlu0 %v138_v13  ;;  %v141_v15 = vsel %vm137_vm0, %v118_v9, 0.0  ;;  %v374_v18 = vsel %vm137_vm0, %v352_v16, 0.0  ;;  %v86_v26 = vld [vmem:[#allocation2 + $0x50] sm:$0xff]  ;;  %v389_v27 = vsel %vm137_vm0, %v357_v20, 0.0  ;;  %v124_v29 = vmul.f32 %v3064_v23, %v83_v22  ;;  %v3084_v45 = vld [vmem:[#allocation4 + $0x18] sm:$0xff]  ;;  %v88_v52 = vld [vmem:[#allocation2 + $0x60] sm:$0xff] }
  0x4f   :  { %v371_v19 = vsel %vm137_vm0, %v351_v17, 0.0  ;;  %v386_v28 = vsel %vm137_vm0, %v356_v21, 0.0  ;;  %v119_v30 = vmul.f32 %v3064_v23, %v78_v24  ;;  %v128_v34 = vmul.f32 %v3046_v6, %v87_v25  ;;  %v79_v46 = vld [vmem:[#allocation2 + $0x18] sm:$0xff]  ;;  %v105_v57 = vld [vmem:[#allocation4 + $0x40] sm:$0xff]  ;;  %v93_v16 = vld [vmem:[#allocation2 + $0x88] sm:$0xff] }
  0x50   :  { %v159_v32 = vsel %vm137_vm0, %v124_v29, 0.0  ;;  %v127_v35 = vmul.f32 %v3042_v1, %v86_v26  ;;  %v358_v38 = vmul.f32 %v3070_v31, %v83_v22  ;;  %v353_v39 = vmul.f32 %v3070_v31, %v78_v24  ;;  %v91_v51 = vld [vmem:[#allocation2 + $0x78] sm:$0xff]  ;;  %v92_v58 = vld [vmem:[#allocation2 + $0x80] sm:$0xff]  ;;  %v3112_v17 = vld [vmem:[#allocation2 + $0x68] sm:$0xff] }
  0x51   :  { %157 = vadd.xlane.f32.xlu1 %v156_v14  ;;  %v144_v33 = vsel %vm137_vm0, %v119_v30, 0.0  ;;  %v171_v36 = vsel %vm137_vm0, %v128_v34, 0.0  ;;  %v362_v42 = vmul.f32 %v3050_v10, %v87_v25  ;;  %v361_v43 = vmul.f32 %v3052_v11, %v86_v26  ;;  %v101_v8 = vld [vmem:[#allocation4 + $0x20] sm:$0xff]  ;;  %v106_v20 = vld [vmem:[#allocation4 + $0x48] sm:$0xff]  ;;  %v94_v29 = vld [vmem:[#allocation2 + $0x90] sm:$0xff] }
  0x52   :  { %142 = vadd.xlane.f32.xlu0 %v141_v15  ;;  %v168_v37 = vsel %vm137_vm0, %v127_v35, 0.0  ;;  %v392_v40 = vsel %vm137_vm0, %v358_v38, 0.0  ;;  %v377_v41 = vsel %vm137_vm0, %v353_v39, 0.0  ;;  %v125_v49 = vmul.f32 %v3084_v45, %v84_v44  ;;  %v3106_v9 = vld [vmem:[#allocation2 + $0x20] sm:$0xff]  ;;  %v3127_v30 = vld [vmem:[#allocation2 + $0x70] sm:$0xff]  ;;  %v3136_v39 = vld [vmem:[#allocation2 + $0x98] sm:$0xff] }
  0x53   :  { %v404_v47 = vsel %vm137_vm0, %v362_v42, 0.0  ;;  %v401_v48 = vsel %vm137_vm0, %v361_v43, 0.0  ;;  %v120_v50 = vmul.f32 %v3084_v45, %v79_v46  ;;  %v132_v55 = vmul.f32 %v3042_v1, %v91_v51 }
  0x54   :  { %v162_v53 = vsel %vm137_vm0, %v125_v49, 0.0  ;;  %v129_v56 = vmul.f32 %v3064_v23, %v88_v52  ;;  %v354_v61 = vmul.f32 %v105_v57, %v79_v46  ;;  %v133_v62 = vmul.f32 %v3046_v6, %v92_v58  ;;  %v3104_v6 = vld [vmem:[#allocation2 + $0x48] sm:$0xff] }
  0x55   :  { %375 = vadd.xlane.f32.xlu1 %v374_v18  ;;  %v147_v54 = vsel %vm137_vm0, %v120_v50, 0.0  ;;  %v183_v59 = vsel %vm137_vm0, %v132_v55, 0.0  ;;  %v363_v1 = vmul.f32 %v3070_v31, %v88_v52  ;;  %v359_v2 = vmul.f32 %v105_v57, %v84_v44 }
  0x56   :  { %372 = vadd.xlane.f32.xlu0 %v371_v19  ;;  %v174_v60 = vsel %vm137_vm0, %v129_v56, 0.0  ;;  %v380_v63 = vsel %vm137_vm0, %v354_v61, 0.0  ;;  %v186_v0 = vsel %vm137_vm0, %v133_v62, 0.0  ;;  %v367_v5 = vmul.f32 %v3050_v10, %v92_v58 }
  0x57   :  { %v407_v3 = vsel %vm137_vm0, %v363_v1, 0.0  ;;  %v395_v4 = vsel %vm137_vm0, %v359_v2, 0.0  ;;  %v366_v7 = vmul.f32 %v3052_v11, %v91_v51  ;;  %v126_v14 = vmul.f32 %v101_v8, %v3104_v6 }
  0x58   :  { %v419_v12 = vsel %vm137_vm0, %v367_v5, 0.0  ;;  %v121_v15 = vmul.f32 %v101_v8, %v3106_v9  ;;  %v134_v18 = vmul.f32 %v3064_v23, %v93_v16  ;;  %v130_v19 = vmul.f32 %v3084_v45, %v3112_v17 }
  0x59   :  { %390 = vadd.xlane.f32.xlu1 %v389_v27  ;;  %v416_v13 = vsel %vm137_vm0, %v366_v7, 0.0  ;;  %v165_v10 = vsel %vm137_vm0, %v126_v14, 0.0  ;;  %v360_v24 = vmul.f32 %v106_v20, %v3104_v6  ;;  %v355_v25 = vmul.f32 %v106_v20, %v3106_v9 }
  0x5a   :  { %387 = vadd.xlane.f32.xlu0 %v386_v28  ;;  %v150_v11 = vsel %vm137_vm0, %v121_v15, 0.0  ;;  %v189_v21 = vsel %vm137_vm0, %v134_v18, 0.0  ;;  %v177_v22 = vsel %vm137_vm0, %v130_v19, 0.0  ;;  %v368_v27 = vmul.f32 %v3070_v31, %v93_v16 }
  0x5b   :  { %v398_v26 = vsel %vm137_vm0, %v360_v24, 0.0  ;;  %v383_v23 = vsel %vm137_vm0, %v355_v25, 0.0  ;;  %v364_v28 = vmul.f32 %v105_v57, %v3112_v17  ;;  %v135_v34 = vmul.f32 %v3084_v45, %v94_v29 }
  0x5c   :  { %v131_v35 = vmul.f32 %v101_v8, %v3127_v30  ;;  %v365_v38 = vmul.f32 %v106_v20, %v3127_v30  ;;  %v370_v42 = vmul.f32 %v106_v20, %v3136_v39  ;;  %v136_v43 = vmul.f32 %v101_v8, %v3136_v39 }
  0x5d   :  { %160 = vadd.xlane.f32.xlu1 %v159_v32  ;;  %v422_v32 = vsel %vm137_vm0, %v368_v27, 0.0  ;;  %v218_v2 = vlaneseq  ;;  %vm1177_vm7 = vcmask 1046528   ;;  %vm1424_vm8 = vcmask 261120  }
  0x5e   :  { %145 = vadd.xlane.f32.xlu0 %v144_v33  ;;  %v410_v33 = vsel %vm137_vm0, %v364_v28, 0.0  ;;  %v180_v31 = vsel %vm137_vm0, %v131_v35, 0.0  ;;  %v428_v44 = vsel %vm137_vm0, %v370_v42, 0.0  ;;  %v195_v45 = vsel %vm137_vm0, %v136_v43, 0.0 }
  0x5f   :  { %v219_v5 = vand.u32 127, %v218_v2  ;;  %v3170_v7 = vshrl.u32 %v218_v2, 7  ;;  %vm2293_vm9 = vcmask 7168   ;;  %vm2299_vm10 = vcmask 11264  }
  0x60   :  { %vm2323_vm11 = vcmask 1043456   ;;  %vm2536_vm12 = vcmask 23552   ;;  %vm2538_vm13 = vcmask 31744  }
  0x61   :  { %172 = vadd.xlane.f32.xlu1 %v171_v36  ;;  %v192_v36 = vsel %vm137_vm0, %v135_v34, 0.0 }
  0x62   :  { %169 = vadd.xlane.f32.xlu0 %v168_v37  ;;  %v369_v37 = vmul.f32 %v105_v57, %v94_v29 }
  0x65   :  { %393 = vadd.xlane.f32.xlu1 %v392_v40  ;;  %v425_v40 = vsel %vm137_vm0, %v369_v37, 0.0 }
  0x66   :  { %378 = vadd.xlane.f32.xlu0 %v377_v41  ;;  %v413_v41 = vsel %vm137_vm0, %v365_v38, 0.0 }
  0x69   :  { %405 = vadd.xlane.f32.xlu1 %v404_v47 }
  0x6a   :  { %402 = vadd.xlane.f32.xlu0 %v401_v48 }
  0x6d   :  { %163 = vadd.xlane.f32.xlu1 %v162_v53 }
  0x6e   :  { %148 = vadd.xlane.f32.xlu0 %v147_v54 }
  0x71   :  { %184 = vadd.xlane.f32.xlu1 %v183_v59 }
  0x72   :  { %175 = vadd.xlane.f32.xlu0 %v174_v60 }
  0x75   :  { %381 = vadd.xlane.f32.xlu1 %v380_v63 }
  0x76   :  { %187 = vadd.xlane.f32.xlu0 %v186_v0 }
  0x79   :  { %408 = vadd.xlane.f32.xlu1 %v407_v3 }
  0x7a   :  { %396 = vadd.xlane.f32.xlu0 %v395_v4 }
  0x7d   :  { %420 = vadd.xlane.f32.xlu1 %v419_v12 }
  0x7e   :  { %417 = vadd.xlane.f32.xlu0 %v416_v13  ;;  %v3175_v13 = vsub.s32 %v219_v5, %v3170_v7 }
  0x80   :  { %4160 = vst [vmem:[#allocation12_spill] sm:$0xff] %v3175_v13 }
  0x81   :  { %166 = vadd.xlane.f32.xlu1 %v165_v10 }
  0x82   :  { %151 = vadd.xlane.f32.xlu0 %v150_v11 }
  0x85   :  { %190 = vadd.xlane.f32.xlu1 %v189_v21 }
  0x86   :  { %178 = vadd.xlane.f32.xlu0 %v177_v22 }
  0x89   :  { %399 = vadd.xlane.f32.xlu1 %v398_v26 }
  0x8a   :  { %384 = vadd.xlane.f32.xlu0 %v383_v23 }
  0x8d   :  { %423 = vadd.xlane.f32.xlu1 %v422_v32 }
  0x8e   :  { %411 = vadd.xlane.f32.xlu0 %v410_v33 }
  0x91   :  { %193 = vadd.xlane.f32.xlu1 %v192_v36 }
  0x92   :  { %181 = vadd.xlane.f32.xlu0 %v180_v31 }
  0x95   :  { %426 = vadd.xlane.f32.xlu1 %v425_v40 }
  0x96   :  { %414 = vadd.xlane.f32.xlu0 %v413_v41 }
  0x99   :  { %429 = vadd.xlane.f32.xlu1 %v428_v44 }
  0x9a   :  { %196 = vadd.xlane.f32.xlu0 %v195_v45 }
  0xda   :  { %v155_v46 = vpop.xlane.xlu1 %154 }
  0xdb   :  { %v140_v47 = vpop.xlane.xlu0 %139  ;;  %v243_v19 = vrot.slane %v155_v46, %v3175_v13 }
  0xdc   :  { %v223_v20 = vrot.slane %v140_v47, %v3175_v13 }
  0xde   :  { %v158_v48 = vpop.xlane.xlu1 %157 }
  0xdf   :  { %v143_v49 = vpop.xlane.xlu0 %142  ;;  %v247_v14 = vrot.slane %v158_v48, %v3175_v13 }
  0xe0   :  { %v227_v15 = vrot.slane %v143_v49, %v3175_v13 }
  0xe1   :  { %v308_v24 = vsel %vm300_vm1, %v247_v14, %v243_v19 }
  0xe2   :  { %v3144_v50 = vpop.xlane.xlu1 %375  ;;  %v301_v25 = vsel %vm300_vm1, %v227_v15, %v223_v20 }
  0xe3   :  { %v3146_v51 = vpop.xlane.xlu0 %372  ;;  %v458_v35 = vrot.slane %v3144_v50, %v3175_v13 }
  0xe4   :  { %v454_v36 = vrot.slane %v3146_v51, %v3175_v13 }
  0xe6   :  { %v3148_v52 = vpop.xlane.xlu1 %390  ;;  %v531_v49 = vsel %vm300_vm1, %v458_v35, %v454_v36 }
  0xe7   :  { %v3150_v53 = vpop.xlane.xlu0 %387  ;;  %v478_v38 = vrot.slane %v3148_v52, %v3175_v13 }
  0xe8   :  { %v474_v40 = vrot.slane %v3150_v53, %v3175_v13 }
  0xea   :  { %v161_v54 = vpop.xlane.xlu1 %160  ;;  %v535_v50 = vsel %vm300_vm1, %v478_v38, %v474_v40 }
  0xeb   :  { %v146_v55 = vpop.xlane.xlu0 %145  ;;  %v251_v11 = vrot.slane %v161_v54, %v3175_v13 }
  0xec   :  { %v231_v18 = vrot.slane %v146_v55, %v3175_v13 }
  0xed   :  { %v309_v29 = vsel %vm302_vm2, %v251_v11, %v308_v24 }
  0xee   :  { %v3152_v56 = vpop.xlane.xlu1 %172  ;;  %v303_v32 = vsel %vm302_vm2, %v231_v18, %v301_v25 }
  0xef   :  { %v3154_v57 = vpop.xlane.xlu0 %169 }
  0xf0   :  { %v263_v5 = vrot.slane %v3154_v57, %v3175_v13 }
  0xf2   :  { %v3156_v58 = vpop.xlane.xlu1 %393 }
  0xf3   :  { %v3158_v59 = vpop.xlane.xlu0 %378  ;;  %v482_v45 = vrot.slane %v3156_v58, %v3175_v13 }
  0xf4   :  { %v462_v46 = vrot.slane %v3158_v59, %v3175_v13 }
  0xf5   :  { %v536_v55 = vsel %vm302_vm2, %v482_v45, %v535_v50 }
  0xf6   :  { %v3160_v60 = vpop.xlane.xlu1 %405  ;;  %v532_v58 = vsel %vm302_vm2, %v462_v46, %v531_v49 }
  0xf7   :  { %v3162_v61 = vpop.xlane.xlu0 %402  ;;  %v498_v20 = vrot.slane %v3160_v60, %v3175_v13 }
  0xfa   :  { %v164_v62 = vpop.xlane.xlu1 %163 }
  0xfb   :  { %v149_v63 = vpop.xlane.xlu0 %148  ;;  %v255_v21 = vrot.slane %v164_v62, %v3175_v13 }
  0xfc   :  { %v235_v22 = vrot.slane %v149_v63, %v3175_v13 }
  0xfd   :  { %v310_v33 = vsel %vm304_vm3, %v255_v21, %v309_v29 }
  0xfe   :  { %v3164_v0 = vpop.xlane.xlu1 %184  ;;  %v305_v34 = vsel %vm304_vm3, %v235_v22, %v303_v32 }
  0xff   :  { %v3166_v1 = vpop.xlane.xlu0 %175 }
 0x100   :  { %v271_v18 = vrot.slane %v3166_v1, %v3175_v13 }
 0x102   :  { %v382_v3 = vpop.xlane.xlu1 %381 }
 0x103   :  { %v3168_v4 = vpop.xlane.xlu0 %187  ;;  %v466_v47 = vrot.slane %v382_v3, %v3175_v13  ;;  %v267_v3 = vrot.slane %v3152_v56, %v3175_v13  ;;  %v494_v56 = vrot.slane %v3162_v61, %v3175_v13 }
 0x104   :  { %v287_v61 = vrot.slane %v3168_v4, %v3175_v13 }
 0x105   :  { %v533_v62 = vsel %vm304_vm3, %v466_v47, %v532_v58  ;;  %v312_v57 = vsel %vm300_vm1, %v267_v3, %v263_v5  ;;  %v539_v60 = vsel %vm300_vm1, %v498_v20, %v494_v56 }
 0x106   :  { %v3172_v8 = vpop.xlane.xlu1 %408  ;;  %v313_v1 = vsel %vm302_vm2, %v271_v18, %v312_v57 }
 0x107   :  { %v397_v12 = vpop.xlane.xlu0 %396  ;;  %v502_v24 = vrot.slane %v3172_v8, %v3175_v13 }
 0x108   :  { %v486_v48 = vrot.slane %v397_v12, %v3175_v13 }
 0x109   :  { %v540_v4 = vsel %vm302_vm2, %v502_v24, %v539_v60 }
 0x10a   :  { %v3179_v16 = vpop.xlane.xlu1 %420  ;;  %v537_v59 = vsel %vm304_vm3, %v486_v48, %v536_v55  ;;  %v3286_v55 = vld [vmem:[%s4116_s1] sm:$0xff] }
 0x10b   :  { %v3181_v10 = vpop.xlane.xlu0 %417 }
 0x10c   :  { %v514_v8 = vrot.slane %v3181_v10, %v3175_v13 }
 0x10e   :  { %v167_v26 = vpop.xlane.xlu1 %166 }
 0x10f   :  { %v152_v23 = vpop.xlane.xlu0 %151  ;;  %v259_v27 = vrot.slane %v167_v26, %v3175_v13 }
 0x110   :  { %v239_v28 = vrot.slane %v152_v23, %v3175_v13 }
 0x111   :  { %v311_v31 = vsel %vm306_vm4, %v259_v27, %v310_v33 }
 0x112   :  { %v307_v37 = vsel %vm306_vm4, %v239_v28, %v305_v34  ;;  %v3207_v41 = vpop.xlane.xlu1 %190  ;;  %v328_v43 = vsel %vm324_vm5, %v311_v31, 0.0  ;;  %v518_v28 = vrot.slane %v3179_v16, %v3175_v13  ;;  %v283_v16 = vrot.slane %v3164_v0, %v3175_v13 }
 0x113   :  { %v179_v42 = vpop.xlane.xlu0 %178  ;;  %v325_v44 = vsel %vm324_vm5, %v307_v37, 0.0  ;;  %329 = vadd.xlane.f32.xlu1 %v328_v43  ;;  %v291_v34 = vrot.slane %v3207_v41, %v3175_v13 }
 0x114   :  { %326 = vadd.xlane.f32.xlu0 %v325_v44  ;;  %v275_v19 = vrot.slane %v179_v42, %v3175_v13  ;;  %v316_v40 = vsel %vm300_vm1, %v287_v61, %v283_v16  ;;  %v543_v41 = vsel %vm300_vm1, %v518_v28, %v514_v8 }
 0x115   :  { %v317_v47 = vsel %vm302_vm2, %v291_v34, %v316_v40 }
 0x116   :  { %v400_v51 = vpop.xlane.xlu1 %399  ;;  %v314_v23 = vsel %vm304_vm3, %v275_v19, %v313_v1 }
 0x117   :  { %v385_v52 = vpop.xlane.xlu0 %384  ;;  %v490_v53 = vrot.slane %v400_v51, %v3175_v13 }
 0x118   :  { %v470_v54 = vrot.slane %v385_v52, %v3175_v13 }
 0x119   :  { %v538_v63 = vsel %vm306_vm4, %v490_v53, %v537_v59  ;;  %v3293_v59 = vsub.s32 0, %v3170_v7 }
 0x11a   :  { %v534_v2 = vsel %vm306_vm4, %v470_v54, %v533_v62  ;;  %v424_v12 = vpop.xlane.xlu1 %423  ;;  %v554_v15 = vsel %vm324_vm5, %v538_v63, 0.0  ;;  %v3281_v54 = vsub.s32 1, %v3170_v7  ;;  %v4121_v63 = vmov 0  }
 0x11b   :  { %v412_v14 = vpop.xlane.xlu0 %411  ;;  %v551_v11 = vsel %vm324_vm5, %v534_v2, 0.0  ;;  %555 = vadd.xlane.f32.xlu1 %v554_v15  ;;  %v522_v35 = vrot.slane %v424_v12, %v3175_v13  ;;  %4162 = vst [vmem:[#allocation14_spill] sm:$0xff] %v3293_v59  ;;  %v3298_v62 = vrot.slane %v3286_v55, %v3293_v59  ;;  %2666 = vset.pattern.permute.xlu0 %v4121_v63 }
 0x11c   :  { %552 = vadd.xlane.f32.xlu0 %v551_v11  ;;  %v506_v26 = vrot.slane %v412_v14, %v3175_v13  ;;  %4161 = vst [vmem:[#allocation13_spill] sm:$0xff] %v3281_v54  ;;  %v3290_v58 = vrot.slane %v3286_v55, %v3281_v54  ;;  %2665 = vset.pattern.permute.xlu1 %v4121_v63 }
 0x11d   :  { %v544_v46 = vsel %vm302_vm2, %v522_v35, %v543_v41  ;;  %4163 = vst [vmem:[#allocation15_spill] sm:$0xff] %v3298_v62  ;;  %2630 = vmatprep.subr.bf16.mxu1 %v4121_v63 }
 0x11e   :  { %v194_v21 = vpop.xlane.xlu1 %193  ;;  %v541_v37 = vsel %vm304_vm3, %v506_v26, %v540_v4 }
 0x11f   :  { %v182_v22 = vpop.xlane.xlu0 %181  ;;  %v295_v31 = vrot.slane %v194_v21, %v3175_v13 }
 0x120   :  { %v279_v25 = vrot.slane %v182_v22, %v3175_v13 }
 0x121   :  { %v318_v49 = vsel %vm304_vm3, %v295_v31, %v317_v47 }
 0x122   :  { %v315_v27 = vsel %vm306_vm4, %v279_v25, %v314_v23  ;;  %v427_v29 = vpop.xlane.xlu1 %426 }
 0x123   :  { %v415_v32 = vpop.xlane.xlu0 %414  ;;  %v331_v33 = vsel %vm324_vm5, %v315_v27, 0.0  ;;  %v526_v10 = vrot.slane %v427_v29, %v3175_v13 }
 0x124   :  { %v510_v36 = vrot.slane %v415_v32, %v3175_v13  ;;  %332 = vadd.xlane.f32.xlu0 %v331_v33 }
 0x125   :  { %v545_v48 = vsel %vm304_vm3, %v526_v10, %v544_v46 }
 0x126   :  { %v542_v38 = vsel %vm306_vm4, %v510_v36, %v541_v37  ;;  %v430_v42 = vpop.xlane.xlu1 %429 }
 0x127   :  { %v197_v43 = vpop.xlane.xlu0 %196  ;;  %v557_v44 = vsel %vm324_vm5, %v542_v38, 0.0  ;;  %v530_v45 = vrot.slane %v430_v42, %v3175_v13 }
 0x128   :  { %v299_v0 = vrot.slane %v197_v43, %v3175_v13  ;;  %558 = vadd.xlane.f32.xlu1 %v557_v44 }
 0x129   :  { %v546_v50 = vsel %vm306_vm4, %v530_v45, %v545_v48 }
 0x12a   :  { %v319_v51 = vsel %vm306_vm4, %v299_v0, %v318_v49  ;;  %v560_v52 = vsel %vm324_vm5, %v546_v50, 0.0 }
 0x12b   :  { %v334_v53 = vsel %vm324_vm5, %v319_v51, 0.0 }
 0x12c   :  { %561 = vadd.xlane.f32.xlu1 %v560_v52  ;;  %335 = vadd.xlane.f32.xlu0 %v334_v53 }
 0x13d   :  { %570 = vbcast.lane.b32.xlu1 %v3290_v58, 258 }
 0x142   :  { %344 = vbcast.lane.b32.xlu0 %v3298_v62, 258 }
 0x1a0   :  { %v330_v2 = vpop.xlane.xlu1 %329 }
 0x1a1   :  { %v327_v3 = vpop.xlane.xlu0 %326 }
 0x1a8   :  { %v556_v5 = vpop.xlane.xlu1 %555 }
 0x1a9   :  { %v553_v12 = vpop.xlane.xlu0 %552 }
 0x1b1   :  { %v333_v14 = vpop.xlane.xlu0 %332 }
 0x1b5   :  { %v559_v15 = vpop.xlane.xlu1 %558 }
 0x1b9   :  { %v562_v11 = vpop.xlane.xlu1 %561  ;;  %v336_v18 = vpop.xlane.xlu0 %335 }
 0x1bd   :  { %v571_v19 = vpop.permute.xlu1 %570  ;;  %v345_v20 = vpop.permute.xlu0 %344 }
 0x1be   :  { %v573_v56 = vadd.f32 %v571_v19, %v553_v12  ;;  %v574_v57 = vadd.f32 %v571_v19, %v556_v5  ;;  %v575_v21 = vadd.f32 %v571_v19, %v559_v15  ;;  %v576_v22 = vadd.f32 %v571_v19, %v562_v11 }
 0x1bf   :  { %v347_v24 = vadd.f32 %v345_v20, %v327_v3  ;;  %v348_v25 = vadd.f32 %v345_v20, %v330_v2  ;;  %v349_v1 = vadd.f32 %v345_v20, %v333_v14  ;;  %v350_v26 = vadd.f32 %v345_v20, %v336_v18 }
 0x1c1   :  { %v577_v23 = vmax.f32 %v347_v24, %v573_v56  ;;  %v578_v60 = vmax.f32 %v348_v25, %v574_v57  ;;  %v579_v27 = vmax.f32 %v349_v1, %v575_v21  ;;  %v580_v61 = vmax.f32 %v350_v26, %v576_v22 }
 0x1c3   :  { %v581_v28 = vsub.f32 %v347_v24, %v577_v23  ;;  %v582_v8 = vsub.f32 %v348_v25, %v578_v60  ;;  %v583_v29 = vsub.f32 %v349_v1, %v579_v27  ;;  %v584_v32 = vsub.f32 %v350_v26, %v580_v61 }
 0x1c4   :  { %v593_v33 = vsub.f32 %v573_v56, %v577_v23  ;;  %v594_v34 = vsub.f32 %v574_v57, %v578_v60  ;;  %v595_v16 = vsub.f32 %v575_v21, %v579_v27  ;;  %v596_v10 = vsub.f32 %v576_v22, %v580_v61 }
 0x1c5   :  { %v585_v35 = vmul.f32 1.442695, %v581_v28  ;;  %v587_v36 = vmul.f32 1.442695, %v582_v8  ;;  %v589_v4 = vmul.f32 1.442695, %v583_v29 }
 0x1c6   :  { %v591_v31 = vmul.f32 1.442695, %v584_v32  ;;  %v597_v37 = vmul.f32 1.442695, %v593_v33  ;;  %v599_v38 = vmul.f32 1.442695, %v594_v34 }
 0x1c7   :  { %2702 = vpow2.f32 %v585_v35  ;;  %v601_v40 = vmul.f32 1.442695, %v595_v16  ;;  %v603_v41 = vmul.f32 1.442695, %v596_v10  ;;  %v3340_v34 = vsub.s32 2, %v3170_v7 }
 0x1c8   :  { %2704 = vpow2.f32 %v587_v36  ;;  %v3345_v16 = vsub.s32 3, %v3170_v7 }
 0x1c9   :  { %2706 = vpow2.f32 %v589_v4  ;;  %4173 = vst [vmem:[#allocation25_spill] sm:$0xff] %v3340_v34 }
 0x1ca   :  { %2708 = vpow2.f32 %v591_v31  ;;  %4174 = vst [vmem:[#allocation26_spill] sm:$0xff] %v3345_v16 }
 0x1cb   :  { %2710 = vpow2.f32 %v597_v37 }
 0x1cc   :  { %2712 = vpow2.f32 %v599_v38 }
 0x1cd   :  { %2714 = vpow2.f32 %v601_v40 }
 0x1ce   :  { %2716 = vpow2.f32 %v603_v41 }
 0x1d1   :  { %v2703_v42 = vpop.eup %2702 }
 0x1d2   :  { %v2705_v43 = vpop.eup %2704 }
 0x1d3   :  { %v2707_v44 = vpop.eup %2706 }
 0x1d4   :  { %v2709_v45 = vpop.eup %2708 }
 0x1d5   :  { %v2711_v0 = vpop.eup %2710 }
 0x1d6   :  { %v2713_v46 = vpop.eup %2712  ;;  %v605_v47 = vadd.f32 %v2711_v0, %v2703_v42 }
 0x1d7   :  { %v2715_v48 = vpop.eup %2714  ;;  %v606_v49 = vadd.f32 %v2713_v46, %v2705_v43 }
 0x1d8   :  { %v2717_v50 = vpop.eup %2716  ;;  %v607_v51 = vadd.f32 %v2715_v48, %v2707_v44  ;;  %2718 = vrcp.f32 %v605_v47 }
 0x1d9   :  { %2720 = vrcp.f32 %v606_v49  ;;  %v608_v52 = vadd.f32 %v2717_v50, %v2709_v45 }
 0x1da   :  { %2722 = vrcp.f32 %v607_v51 }
 0x1db   :  { %2724 = vrcp.f32 %v608_v52 }
 0x1e2   :  { %v2719_v53 = vpop.eup %2718 }
 0x1e3   :  { %v2721_v2 = vpop.eup %2720  ;;  %v3304_v3 = vmul.f32 %v2719_v53, %v2703_v42  ;;  %v3306_v5 = vmul.f32 %v2719_v53, %v2711_v0 }
 0x1e4   :  { %v2723_v12 = vpop.eup %2722  ;;  %v3308_v14 = vmul.f32 %v2721_v2, %v2705_v43  ;;  %v3316_v19 = vmul.f32 %v2721_v2, %v2713_v46 }
 0x1e5   :  { %4164 = vst [vmem:[#allocation16_spill] sm:$0xff] %v3304_v3  ;;  %4165 = vst [vmem:[#allocation17_spill] sm:$0xff] %v3306_v5  ;;  %v3310_v15 = vmul.f32 %v2723_v12, %v2707_v44  ;;  %v3312_v11 = vmul.f32 %v2723_v12, %v2715_v48  ;;  %v621_v18 = vmax.f32 %v3304_v3, %v3306_v5  ;;  %v2725_v20 = vpop.eup %2724 }
 0x1e6   :  { %4166 = vst [vmem:[#allocation18_spill] sm:$0xff] %v3308_v14  ;;  %4169 = vst [vmem:[#allocation21_spill] sm:$0xff] %v3316_v19  ;;  %v622_v57 = vmax.f32 %v3308_v14, %v3316_v19  ;;  %v3322_v21 = vmul.f32 %v2725_v20, %v2709_v45  ;;  %v3324_v22 = vmul.f32 %v2725_v20, %v2717_v50 }
 0x1e7   :  { %4167 = vst [vmem:[#allocation19_spill] sm:$0xff] %v3310_v15  ;;  %4168 = vst [vmem:[#allocation20_spill] sm:$0xff] %v3312_v11  ;;  %v623_v56 = vmax.f32 %v3310_v15, %v3312_v11  ;;  %630 = vperm.xlu1 %2665, %v621_v18  }
 0x1e8   :  { %4170 = vst [vmem:[#allocation22_spill] sm:$0xff] %v3322_v21  ;;  %4171 = vst [vmem:[#allocation23_spill] sm:$0xff] %v3324_v22  ;;  %v624_v24 = vmax.f32 %v3322_v21, %v3324_v22 }
 0x1e9   :  { %636 = vperm.xlu0 %2666, %v623_v56  }
 0x1eb   :  { %633 = vperm.xlu1 %2665, %v622_v57  }
 0x1ef   :  { %639 = vperm.xlu1 %2665, %v624_v24  }
 0x266   :  { %v631_v25 = vpop.permute.xlu1 %630 }
 0x267   :  { %v644_v23 = vrot.slane %v631_v25, %v3175_v13 }
 0x268   :  { %v637_v26 = vpop.permute.xlu0 %636 }
 0x269   :  { %v652_v61 = vrot.slane %v637_v26, %v3175_v13 }
 0x26a   :  { %v634_v1 = vpop.permute.xlu1 %633 }
 0x26b   :  { %v648_v60 = vrot.slane %v634_v1, %v3175_v13 }
 0x26d   :  { %v657_v27 = vsel %vm300_vm1, %v648_v60, %v644_v23  ;;  %v2943_v60 = vmov 1966171168  }
 0x26e   :  { %v640_v28 = vpop.permute.xlu1 %639  ;;  %v658_v29 = vsel %vm302_vm2, %v652_v61, %v657_v27  ;;  %v777_v27 = vunpack.c.l.s4 %v2943_v60 }
 0x26f   :  { %v656_v8 = vrot.slane %v640_v28, %v3175_v13 }
 0x270   :  { %v778_v61 = vunpack.c.0.s8 %v777_v27 }
 0x271   :  { %v3335_v32 = vsel %vm304_vm3, %v656_v8, %v658_v29 }
 0x272   :  { %4172 = vst [vmem:[#allocation24_spill] sm:$0xff] %v3335_v32  ;;  %v667_v33 = vsel %vm661_vm6, %v3335_v32, -inf  ;;  %v3364_v28 = vsub.s32 %v778_v61, %v3170_v7  ;;  %v2671_v61 = vld [vmem:[#allocation6 + $0x10] sm:$0x7f]  }
 0x273   :  { %668 = vmax.xlane.f32.xlu1 %v667_v33 }
 0x300   :  { %v669_v35 = vpop.xlane.xlu1 %668 }
 0x301   :  { %v674_v36 = vrot.slane %v669_v35, %v3293_v59  ;;  %v678_v4 = vrot.slane %v669_v35, %v3281_v54  ;;  %v682_v31 = vrot.slane %v669_v35, %v3340_v34  ;;  %v686_v40 = vrot.slane %v669_v35, %v3345_v16 }
 0x303   :  { %v691_v10 = vsub.f32 %v621_v18, %v674_v36  ;;  %v692_v37 = vsub.f32 %v622_v57, %v678_v4  ;;  %v693_v41 = vsub.f32 %v623_v56, %v682_v31  ;;  %v694_v43 = vsub.f32 %v624_v24, %v686_v40 }
 0x305   :  { %v695_v38 = vmul.f32 1.442695, %v691_v10  ;;  %v697_v42 = vmul.f32 1.442695, %v692_v37  ;;  %v699_v44 = vmul.f32 1.442695, %v693_v41 }
 0x306   :  { %v701_v45 = vmul.f32 1.442695, %v694_v43 }
 0x307   :  { %2726 = vpow2.f32 %v695_v38 }
 0x308   :  { %2728 = vpow2.f32 %v697_v42 }
 0x309   :  { %2730 = vpow2.f32 %v699_v44 }
 0x30a   :  { %2732 = vpow2.f32 %v701_v45 }
 0x311   :  { %v2727_v0 = vpop.eup %2726 }
 0x312   :  { %708 = vperm.xlu0 %2666, %v2727_v0   ;;  %v2729_v46 = vpop.eup %2728 }
 0x313   :  { %v2731_v47 = vpop.eup %2730 }
 0x314   :  { %v3349_v48 = vpop.eup %2732 }
 0x316   :  { %711 = vperm.xlu0 %2666, %v2729_v46  }
 0x31a   :  { %714 = vperm.xlu0 %2666, %v2731_v47  }
 0x31e   :  { %717 = vperm.xlu0 %2666, %v3349_v48  }
 0x391   :  { %v709_v49 = vpop.permute.xlu0 %708 }
 0x392   :  { %v722_v2 = vrot.slane %v709_v49, %v3175_v13 }
 0x395   :  { %v712_v50 = vpop.permute.xlu0 %711 }
 0x396   :  { %v726_v52 = vrot.slane %v712_v50, %v3175_v13 }
 0x398   :  { %v735_v20 = vsel %vm300_vm1, %v726_v52, %v722_v2 }
 0x399   :  { %v715_v51 = vpop.permute.xlu0 %714 }
 0x39a   :  { %v730_v53 = vrot.slane %v715_v51, %v3175_v13 }
 0x39c   :  { %v736_v56 = vsel %vm302_vm2, %v730_v53, %v735_v20  ;;  %v2669_v20 = vld [vmem:[#allocation6] sm:$0xff]  }
 0x39d   :  { %v718_v12 = vpop.permute.xlu0 %717  ;;  %2604 = vmatprep.subr.bf16.mxu0 %v2669_v20 }
 0x39e   :  { %v734_v18 = vrot.slane %v718_v12, %v3175_v13  ;;  %2605 = vmatpush3.bf16.msra.mxu0 %v2669_v20 }
 0x3a0   :  { %v737_v57 = vsel %vm304_vm3, %v734_v18, %v736_v56 }
 0x3a1   :  { %v739_v24 = vsel %vm661_vm6, %v737_v57, 0.0 }
 0x3a2   :  { %740 = vadd.xlane.f32.xlu0 %v739_v24 }
 0x42f   :  { %v741_v25 = vpop.xlane.xlu0 %740 }
 0x430   :  { %v746_v1 = vrot.slane %v741_v25, %v3293_v59  ;;  %v750_v26 = vrot.slane %v741_v25, %v3281_v54  ;;  %v754_v23 = vrot.slane %v741_v25, %v3340_v34  ;;  %v758_v29 = vrot.slane %v741_v25, %v3345_v16  ;;  %v2670_v25 = vld [vmem:[#allocation6 + $0x8] sm:$0xff]  }
 0x431   :  { %2606 = vmatprep.subr.bf16.mxu0 %v2670_v25 }
 0x432   :  { %2734 = vrcp.f32 %v746_v1  ;;  %2607 = vmatpush3.bf16.msra.mxu0 %v2670_v25  ;;  %v1587_v25 = vrot.slane %v3286_v55, %v3345_v16 }
 0x433   :  { %2736 = vrcp.f32 %v750_v26  ;;  %2650 = vmatprep.subr.msk.bf16.mxu0 %vm1177_vm7, %v2671_v61 }
 0x434   :  { %2738 = vrcp.f32 %v754_v23 }
 0x435   :  { %2740 = vrcp.f32 %v758_v29 }
 0x43c   :  { %v2735_v8 = vpop.eup %2734 }
 0x43d   :  { %v2737_v33 = vpop.eup %2736  ;;  %v764_v35 = vmul.f32 %v2735_v8, %v2727_v0 }
 0x43e   :  { %v2739_v36 = vpop.eup %2738  ;;  %v766_v4 = vmul.f32 %v2737_v33, %v2729_v46 }
 0x43f   :  { %v782_v31 = vrot.slane %v764_v35, %v3364_v28  ;;  %v775_v10 = vcombine.high %v764_v35, %v764_v35  ;;  %v3370_v42 = vmul.f32 %v2739_v36, %v2731_v47  ;;  %v2741_v56 = vpop.eup %2740  ;;  %v1179_v36 = vsel %vm1177_vm7, %v2671_v61, 0  ;;  %v2825_v61 = vld [vmem:[#allocation2 + $0x8] sm:$0xff] }
 0x440   :  { %v821_v37 = vrot.slane %v766_v4, %v3364_v28  ;;  %v814_v41 = vcombine.high %v766_v4, %v766_v4  ;;  %v770_v23 = vmul.f32 %v2741_v56, %v3349_v48  ;;  %2609 = vmatpush3.bf16.msra.mxu0 %v1179_v36  ;;  %v2826_v36 = vld [vmem:[#allocation2 + $0x10] sm:$0xff] }
 0x441   :  { %v797_v38 = vrot.slane %v782_v31, %v3364_v28  ;;  %v790_v40 = vcombine.high %v782_v31, %v782_v31  ;;  %v789_v46 = vrot.slane %v775_v10, %v3364_v28  ;;  %v860_v52 = vrot.slane %v3370_v42, %v3364_v28  ;;  %1455 = vmatprep.subr.bf16.mxu0 %v4121_v63 }
 0x442   :  { %v836_v43 = vrot.slane %v821_v37, %v3364_v28  ;;  %v828_v51 = vrot.slane %v814_v41, %v3364_v28  ;;  %v829_v27 = vcombine.high %v821_v37, %v821_v37  ;;  %v899_v33 = vrot.slane %v770_v23, %v3364_v28 }
 0x443   :  { %v934_v44 = vrot.slane %v797_v38, %v3293_v59  ;;  %v811_v45 = vrot.slane %v790_v40, %v3364_v28  ;;  %v812_v0 = vcombine.high %v797_v38, %v797_v38  ;;  %v804_v53 = vrot.slane %v789_v46, %v3364_v28 }
 0x444   :  { %v851_v50 = vcombine.high %v836_v43, %v836_v43  ;;  %v843_v12 = vrot.slane %v828_v51, %v3364_v28  ;;  %v868_v18 = vcombine.high %v860_v52, %v860_v52  ;;  %v954_v35 = vrot.slane %v836_v43, %v3293_v59 }
 0x445   :  { %1012 = vperm.xlu1 %2665, %v934_v44   ;;  %v938_v49 = vrot.slane %v811_v45, %v3293_v59  ;;  %v942_v47 = vrot.slane %v812_v0, %v3293_v59  ;;  %v950_v57 = vrot.slane %v804_v53, %v3293_v59  ;;  %v813_v24 = vcombine.high %v811_v45, %v811_v45 }
 0x446   :  { %v962_v2 = vrot.slane %v851_v50, %v3293_v59  ;;  %v970_v1 = vrot.slane %v843_v12, %v3293_v59  ;;  %v889_v26 = vrot.slane %v868_v18, %v3364_v28  ;;  %v850_v48 = vrot.slane %v829_v27, %v3364_v28 }
 0x447   :  { %1016 = vperm.xlu0 %2666, %v938_v49   ;;  %v946_v60 = vrot.slane %v813_v24, %v3293_v59  ;;  %v914_v31 = vrot.slane %v899_v33, %v3364_v28  ;;  %v892_v10 = vcombine.high %v770_v23, %v770_v23  ;;  %v875_v45 = vrot.slane %v860_v52, %v3364_v28  ;;  %v2674_v24 = vld [vmem:[#allocation7 + $0x44] ss:$8 sps:$4 sm:$0xff]  }
 0x448   :  { %v978_v8 = vrot.slane %v889_v26, %v3293_v59  ;;  %v891_v29 = vcombine.high %v889_v26, %v889_v26  ;;  %v958_v37 = vrot.slane %v850_v48, %v3293_v59  ;;  %v852_v38 = vcombine.high %v850_v48, %v850_v48  ;;  %2585 = vmatprep.mubr.msk.bf16.mxu1 %vm1424_vm8, %v2674_v24 }
 0x449   :  { %1020 = vperm.xlu1 %2665, %v942_v47   ;;  %v994_v40 = vrot.slane %v914_v31, %v3293_v59  ;;  %v929_v41 = vcombine.high %v914_v31, %v914_v31  ;;  %v906_v43 = vrot.slane %v892_v10, %v3364_v28  ;;  %v853_v0 = vcombine.high %v3370_v42, %v3370_v42  ;;  %v2827_v31 = vld [vmem:[#allocation2 + $0x18] sm:$0xff] }
 0x44a   :  { %v986_v4 = vrot.slane %v891_v29, %v3293_v59  ;;  %v966_v44 = vrot.slane %v852_v38, %v3293_v59  ;;  %v974_v50 = vrot.slane %v875_v45, %v3293_v59  ;;  %v890_v51 = vcombine.high %v875_v45, %v875_v45 }
 0x44b   :  { %1040 = vperm.xlu0 %2666, %v962_v2   ;;  %v1002_v46 = vrot.slane %v929_v41, %v3293_v59  ;;  %v921_v49 = vrot.slane %v906_v43, %v3364_v28  ;;  %v867_v47 = vrot.slane %v853_v0, %v3364_v28  ;;  %v907_v42 = vcombine.high %v899_v33, %v899_v33  ;;  %v2828_v41 = vld [vmem:[#allocation2 + $0x28] sm:$0xff] }
 0x44c   :  { %v982_v52 = vrot.slane %v890_v51, %v3293_v59 }
 0x44d   :  { %1028 = vperm.xlu1 %2665, %v950_v57   ;;  %v1010_v53 = vrot.slane %v921_v49, %v3293_v59  ;;  %v882_v2 = vrot.slane %v867_v47, %v3364_v28  ;;  %v928_v18 = vrot.slane %v907_v42, %v3364_v28  ;;  %v1594_v28 = vsub.s32 4, %v3170_v7 }
 0x44f   :  { %1048 = vperm.xlu0 %2666, %v970_v1   ;;  %v990_v12 = vrot.slane %v882_v2, %v3293_v59  ;;  %v998_v20 = vrot.slane %v928_v18, %v3293_v59  ;;  %v930_v56 = vcombine.high %v928_v18, %v928_v18  ;;  %v1595_v1 = vrot.slane %v3286_v55, %v1594_v28  ;;  %v2831_v2 = vld [vmem:[#allocation2 + $0x40] sm:$0xff] }
 0x451   :  { %1024 = vperm.xlu1 %2665, %v946_v60   ;;  %v1006_v57 = vrot.slane %v930_v56, %v3293_v59  ;;  %v2824_v60 = vld [vmem:[#allocation2] sm:$0xff] }
 0x453   :  { %1056 = vperm.xlu0 %2666, %v978_v8  }
 0x455   :  { %1032 = vperm.xlu1 %2665, %v954_v35  }
 0x457   :  { %1064 = vperm.xlu0 %2666, %v986_v4  }
 0x459   :  { %1036 = vperm.xlu1 %2665, %v958_v37  }
 0x45b   :  { %1072 = vperm.xlu0 %2666, %v994_v40  }
 0x45d   :  { %1044 = vperm.xlu1 %2665, %v966_v44  }
 0x45f   :  { %1080 = vperm.xlu0 %2666, %v1002_v46   ;;  %v2829_v46 = vld [vmem:[#allocation2 + $0x38] sm:$0xff] }
 0x461   :  { %1052 = vperm.xlu1 %2665, %v974_v50  }
 0x463   :  { %1088 = vperm.xlu0 %2666, %v1010_v53  }
 0x465   :  { %1060 = vperm.xlu1 %2665, %v982_v52  }
 0x467   :  { %1574 = vbcast.lane.b32.xlu0 %v3290_v58, 309  ;;  %v1579_v58 = vrot.slane %v3286_v55, %v3340_v34 }
 0x469   :  { %1068 = vperm.xlu1 %2665, %v990_v12  }
 0x46b   :  { %1590 = vbcast.lane.b32.xlu0 %v1587_v25, 309 }
 0x46d   :  { %1076 = vperm.xlu1 %2665, %v998_v20   ;;  %v2832_v20 = vld [vmem:[#allocation2 + $0x58] sm:$0xff] }
 0x46f   :  { %1144 = vrot.lane.b32.xlu0 %v3298_v62, %s2944_s6 }
 0x471   :  { %1084 = vperm.xlu1 %2665, %v1006_v57  }
 0x475   :  { %1570 = vbcast.lane.b32.xlu1 %v3298_v62, 309 }
 0x479   :  { %1582 = vbcast.lane.b32.xlu1 %v1579_v58, 309 }
 0x47d   :  { %1598 = vbcast.lane.b32.xlu1 %v1595_v1, 309  ;;  %v2834_v1 = vld [vmem:[#allocation2 + $0x60] sm:$0xff] }
 0x4c4   :  { %v1013_v26 = vpop.permute.xlu1 %1012 }
 0x4c5   :  { %v3424_v27 = vmul.f32 %v2824_v60, %v1013_v26 }
 0x4c6   :  { %v1017_v23 = vpop.permute.xlu0 %1016 }
 0x4c7   :  { %v3426_v8 = vmul.f32 %v2825_v61, %v1017_v23 }
 0x4c8   :  { %v1021_v29 = vpop.permute.xlu1 %1020 }
 0x4c9   :  { %v1111_v7 = vpack.c.bf16 %v3426_v8, %v3424_v27  ;;  %v3432_v4 = vmul.f32 %v2826_v36, %v1021_v29  ;;  %v2835_v29 = vld [vmem:[#allocation2 + $0x78] sm:$0xff]  ;;  %v2837_v36 = vld [vmem:[#allocation2 + $0x80] sm:$0xff] }
 0x4ca   :  { %v1041_v33 = vpop.permute.xlu0 %1040 }
 0x4cb   :  { %2610 = vmatprep.mubr.msk.bf16.mxu0 %vm137_vm0, %v1111_v7  ;;  %2640 = vmatpush1.bf16.msra.mxu1 %v1111_v7  ;;  %4175 = vst [vmem:[#allocation27_spill] sm:$0xff] %v3432_v4  ;;  %v3448_v49 = vmul.f32 %v2829_v46, %v1041_v33 }
 0x4cc   :  { %v1029_v55 = vpop.permute.xlu1 %1028  ;;  %2631 = vmatprep.subr.bf16.mxu1 %v4121_v63 }
 0x4cd   :  { %v3439_v40 = vmul.f32 %v1029_v55, %v3106_v9  ;;  %4178 = vst [vmem:[#allocation30_spill] sm:$0xff] %v3448_v49  ;;  %v2830_v9 = vld [vmem:[#allocation2 + $0x30] sm:$0xff] }
 0x4ce   :  { %v1049_v35 = vpop.permute.xlu0 %1048 }
 0x4cf   :  { %4177 = vst [vmem:[#allocation29_spill] sm:$0xff] %v3439_v40  ;;  %v3458_v52 = vmul.f32 %v1049_v35, %v3104_v6  ;;  %v2833_v6 = vld [vmem:[#allocation2 + $0x50] sm:$0xff]  ;;  %v2836_v35 = vld [vmem:[#allocation2 + $0x88] sm:$0xff] }
 0x4d0   :  { %v1025_v48 = vpop.permute.xlu1 %1024 }
 0x4d1   :  { %v3434_v10 = vmul.f32 %v2827_v31, %v1025_v48  ;;  %4179 = vst [vmem:[#allocation31_spill] sm:$0xff] %v3458_v52 }
 0x4d2   :  { %v1057_v44 = vpop.permute.xlu0 %1056 }
 0x4d3   :  { %4176 = vst [vmem:[#allocation28_spill] sm:$0xff] %v3434_v10  ;;  %v1112_v37 = vpack.c.bf16 %v3434_v10, %v3432_v4  ;;  %v3467_v56 = vmul.f32 %v2832_v20, %v1057_v44  ;;  %v2838_v44 = vld [vmem:[#allocation2 + $0x90] sm:$0xff]  ;;  %v2686_v20 = vld [vmem:[#allocation7 + $0x60] ss:$8 sps:$4 sm:$0xff]  }
 0x4d4   :  { %v1033_v38 = vpop.permute.xlu1 %1032 }
 0x4d5   :  { %v3441_v43 = vmul.f32 %v2828_v41, %v1033_v38  ;;  %2611 = vmatmul.mubr.msk.bf16.vlgmr.msra.gmra.mrb[0].mxu0 %vm137_vm0, %v1112_v37  ;;  %2641 = vmatpush1.bf16.msra.mxu1 %v1112_v37  ;;  %4181 = vst [vmem:[#allocation33_spill] sm:$0xff] %v3467_v56 }
 0x4d6   :  { %1456 = vmatpush1.bf16.msra.mxu0 %v1111_v7  ;;  %2632 = vmatprep.subr.bf16.mxu1 %v4121_v63  ;;  %v1065_v47 = vpop.permute.xlu0 %1064 }
 0x4d7   :  { %v1113_v45 = vpack.c.bf16 %v3441_v43, %v3439_v40  ;;  %1457 = vmatprep.subr.bf16.mxu0 %v4121_v63  ;;  %v3477_v28 = vmul.f32 %v1065_v47, %v3112_v17  ;;  %v2681_v47 = vld [vmem:[#allocation7 + $0x14] ss:$8 sps:$4 sm:$0xff]  }
 0x4d8   :  { %v1037_v0 = vpop.permute.xlu1 %1036 }
 0x4d9   :  { %v3450_v50 = vmul.f32 %v2830_v9, %v1037_v0  ;;  %2614 = vmatprep.mubr.msk.bf16.mxu0 %vm137_vm0, %v1113_v45  ;;  %2642 = vmatpush1.bf16.msra.mxu1 %v1113_v45  ;;  %4182 = vst [vmem:[#allocation34_spill] sm:$0xff] %v3477_v28  ;;  %v2677_v0 = vld [vmem:[#allocation7 + $0x4] ss:$8 sps:$4 sm:$0xff]   ;;  %v2672_v9 = vld [vmem:[#allocation7 + $0x40] ss:$8 sps:$4 sm:$0xff]  }
 0x4da   :  { %1458 = vmatpush1.bf16.msra.mxu0 %v1112_v37  ;;  %2633 = vmatprep.subr.bf16.mxu1 %v4121_v63  ;;  %v1073_v24 = vpop.permute.xlu0 %1072 }
 0x4db   :  { %v1114_v51 = vpack.c.bf16 %v3448_v49, %v3450_v50  ;;  %1459 = vmatprep.subr.bf16.mxu0 %v4121_v63  ;;  %v3486_v7 = vmul.f32 %v2835_v29, %v1073_v24  ;;  %v2689_v24 = vld [vmem:[#allocation7 + $0x20] ss:$8 sps:$4 sm:$0xff]   ;;  %v2701_v29 = vld [vmem:[#allocation7 + $0x90] ss:$8 sps:$4 sm:$0xff]  }
 0x4dc   :  { %v1045_v53 = vpop.permute.xlu1 %1044 }
 0x4dd   :  { %v3460_v42 = vmul.f32 %v2831_v2, %v1045_v53  ;;  %2615 = vmatmul.mubr.msk.bf16.gmra.mrb[4].mxu0 %vm137_vm0, %v1114_v51  ;;  %2643 = vmatpush1.bf16.msra.mxu1 %v1114_v51  ;;  %v2680_v53 = vld [vmem:[#allocation7 + $0x50] ss:$8 sps:$4 sm:$0xff]   ;;  %v2684_v2 = vld [vmem:[#allocation7 + $0x64] ss:$8 sps:$4 sm:$0xff]  }
 0x4de   :  { %1460 = vmatpush1.bf16.msra.mxu0 %v1113_v45  ;;  %2634 = vmatprep.subr.bf16.mxu1 %v4121_v63  ;;  %v1081_v60 = vpop.permute.xlu0 %1080 }
 0x4df   :  { %4180 = vst [vmem:[#allocation32_spill] sm:$0xff] %v3460_v42  ;;  %v1115_v12 = vpack.c.bf16 %v3458_v52, %v3460_v42  ;;  %1461 = vmatprep.subr.bf16.mxu0 %v4121_v63  ;;  %v3496_v48 = vmul.f32 %v2836_v35, %v1081_v60  ;;  %v2698_v60 = vld [vmem:[#allocation7 + $0x80] ss:$8 sps:$4 sm:$0xff]  }
 0x4e0   :  { %v1053_v18 = vpop.permute.xlu1 %1052 }
 0x4e1   :  { %v3469_v57 = vmul.f32 %v2833_v6, %v1053_v18  ;;  %2618 = vmatprep.mubr.msk.bf16.mxu0 %vm137_vm0, %v1115_v12  ;;  %2644 = vmatpush1.bf16.msra.mxu1 %v1115_v12  ;;  %4185 = vst [vmem:[#allocation37_spill] sm:$0xff] %v3496_v48  ;;  %v2687_v18 = vld [vmem:[#allocation7 + $0x24] ss:$8 sps:$4 sm:$0xff]   ;;  %v2690_v6 = vld [vmem:[#allocation7 + $0x74] ss:$8 sps:$4 sm:$0xff]  }
 0x4e2   :  { %1462 = vmatpush1.bf16.msra.mxu0 %v1114_v51  ;;  %2635 = vmatprep.subr.bf16.mxu1 %v4121_v63  ;;  %v2675_v51 = vld [vmem:[#allocation7] ss:$8 sps:$4 sm:$0xff]  }
 0x4e3   :  { %v1116_v25 = vpack.c.bf16 %v3467_v56, %v3469_v57  ;;  %1463 = vmatprep.subr.bf16.mxu0 %v4121_v63 }
 0x4e4   :  { %v1061_v58 = vpop.permute.xlu1 %1060 }
 0x4e5   :  { %v3479_v26 = vmul.f32 %v2834_v1, %v1061_v58  ;;  %2619 = vmatmul.mubr.msk.bf16.gmra.mrb[8].mxu0 %vm137_vm0, %v1116_v25  ;;  %2645 = vmatpush1.bf16.msra.mxu1 %v1116_v25  ;;  %v2692_v58 = vld [vmem:[#allocation7 + $0x70] ss:$8 sps:$4 sm:$0xff]   ;;  %v2696_v1 = vld [vmem:[#allocation7 + $0x84] ss:$8 sps:$4 sm:$0xff]  }
 0x4e6   :  { %1464 = vmatpush1.bf16.msra.mxu0 %v1115_v12  ;;  %2636 = vmatprep.subr.bf16.mxu1 %v4121_v63  ;;  %v2683_v12 = vld [vmem:[#allocation7 + $0x10] ss:$8 sps:$4 sm:$0xff]  }
 0x4e7   :  { %4183 = vst [vmem:[#allocation35_spill] sm:$0xff] %v3479_v26  ;;  %v1117_v23 = vpack.c.bf16 %v3477_v28, %v3479_v26  ;;  %1465 = vmatprep.subr.bf16.mxu0 %v4121_v63 }
 0x4e8   :  { %v1069_v61 = vpop.permute.xlu1 %1068 }
 0x4e9   :  { %v3489_v17 = vmul.f32 %v1069_v61, %v3127_v30  ;;  %2622 = vmatprep.mubr.msk.bf16.mxu0 %vm137_vm0, %v1117_v23  ;;  %2646 = vmatpush1.bf16.msra.mxu1 %v1117_v23  ;;  %v1089_v30 = vpop.permute.xlu0 %1088  ;;  %v2699_v61 = vld [vmem:[#allocation7 + $0x94] ss:$8 sps:$4 sm:$0xff]  }
 0x4ea   :  { %1466 = vmatpush1.bf16.msra.mxu0 %v1116_v25  ;;  %2637 = vmatprep.subr.bf16.mxu1 %v4121_v63  ;;  %v3506_v41 = vmul.f32 %v1089_v30, %v3136_v39  ;;  %v2678_v39 = vld [vmem:[#allocation7 + $0x54] ss:$8 sps:$4 sm:$0xff]  }
 0x4eb   :  { %4184 = vst [vmem:[#allocation36_spill] sm:$0xff] %v3489_v17  ;;  %v1118_v33 = vpack.c.bf16 %v3486_v7, %v3489_v17  ;;  %1467 = vmatprep.subr.bf16.mxu0 %v4121_v63  ;;  %v2693_v25 = vld [vmem:[#allocation7 + $0x34] ss:$8 sps:$4 sm:$0xff]  }
 0x4ec   :  { %v1077_v55 = vpop.permute.xlu1 %1076  ;;  %4187 = vst [vmem:[#allocation39_spill] sm:$0xff] %v3506_v41 }
 0x4ed   :  { %v3498_v31 = vmul.f32 %v2837_v36, %v1077_v55  ;;  %2623 = vmatmul.mubr.msk.bf16.gmra.mrb[12].mxu0 %vm137_vm0, %v1118_v33  ;;  %2647 = vmatpush1.bf16.msra.mxu1 %v1118_v33 }
 0x4ee   :  { %1468 = vmatpush1.bf16.msra.mxu0 %v1117_v23  ;;  %2638 = vmatprep.subr.bf16.mxu1 %v4121_v63  ;;  %v2695_v23 = vld [vmem:[#allocation7 + $0x30] ss:$8 sps:$4 sm:$0xff]  }
 0x4ef   :  { %4186 = vst [vmem:[#allocation38_spill] sm:$0xff] %v3498_v31  ;;  %v1119_v37 = vpack.c.bf16 %v3496_v48, %v3498_v31  ;;  %1469 = vmatprep.subr.bf16.mxu0 %v4121_v63 }
 0x4f0   :  { %v1085_v38 = vpop.permute.xlu1 %1084 }
 0x4f1   :  { %v3508_v45 = vmul.f32 %v2838_v44, %v1085_v38  ;;  %2626 = vmatprep.mubr.msk.bf16.mxu0 %vm137_vm0, %v1119_v37  ;;  %2648 = vmatpush1.bf16.msra.mxu1 %v1119_v37 }
 0x4f2   :  { %1470 = vmatpush1.bf16.msra.mxu0 %v1118_v33  ;;  %2639 = vmatprep.subr.bf16.mxu1 %v4121_v63 }
 0x4f3   :  { %4188 = vst [vmem:[#allocation40_spill] sm:$0xff] %v3508_v45  ;;  %v1120_v46 = vpack.c.bf16 %v3506_v41, %v3508_v45  ;;  %1471 = vmatprep.subr.bf16.mxu0 %v4121_v63 }
 0x4f5   :  { %2627 = vmatmul.mubr.msk.bf16.gmra.mrb[16].mxu0 %vm137_vm0, %v1120_v46  ;;  %2649 = vmatpush1.bf16.msra.mxu1 %v1120_v46 }
 0x4f6   :  { %1472 = vmatpush1.bf16.msra.mxu0 %v1119_v37  ;;  %2581 = vmatprep.mubr.msk.bf16.mxu0 %vm1424_vm8, %v2677_v0 }
 0x4f7   :  { %1473 = vmatprep.subr.bf16.mxu0 %v4121_v63 }
 0x4f8   :  { %1520 = vmatmul.mubr.bf16.vlgmr.msra.gmra.mrb[0].mxu1 %v2672_v9 }
 0x4f9   :  { %2586 = vmatprep.mubr.msk.bf16.mxu1 %vm1424_vm8, %v2678_v39 }
 0x4fa   :  { %1474 = vmatpush1.bf16.msra.mxu0 %v1120_v46 }
 0x4fd   :  { %1488 = vmatmul.mubr.bf16.vlgmr.msra.gmra.mrb[20].mxu0 %v2675_v51 }
 0x4fe   :  { %2582 = vmatprep.mubr.msk.bf16.mxu0 %vm1424_vm8, %v2681_v47 }
 0x500   :  { %1528 = vmatmul.mubr.bf16.gmra.mrb[4].mxu1 %v2680_v53 }
 0x501   :  { %2587 = vmatprep.mubr.msk.bf16.mxu1 %vm1424_vm8, %v2684_v2 }
 0x505   :  { %1496 = vmatmul.mubr.bf16.gmra.mrb[24].mxu0 %v2683_v12 }
 0x506   :  { %2583 = vmatprep.mubr.msk.bf16.mxu0 %vm1424_vm8, %v2687_v18 }
 0x508   :  { %1536 = vmatmul.mubr.bf16.gmra.mrb[8].mxu1 %v2686_v20 }
 0x509   :  { %2588 = vmatprep.mubr.msk.bf16.mxu1 %vm1424_vm8, %v2690_v6 }
 0x50d   :  { %1504 = vmatmul.mubr.bf16.gmra.mrb[28].mxu0 %v2689_v24 }
 0x50e   :  { %2584 = vmatprep.mubr.msk.bf16.mxu0 %vm1424_vm8, %v2693_v25 }
 0x510   :  { %1544 = vmatmul.mubr.bf16.gmra.mrb[12].mxu1 %v2692_v58 }
 0x511   :  { %2589 = vmatprep.mubr.msk.bf16.mxu1 %vm1424_vm8, %v2696_v1 }
 0x515   :  { %1512 = vmatmul.mubr.bf16.gmra.mrb[32].mxu0 %v2695_v23  ;;  %v1571_v23 = vpop.permute.xlu1 %1570 }
 0x518   :  { %1552 = vmatmul.mubr.bf16.gmra.mrb[16].mxu1 %v2698_v60 }
 0x519   :  { %2590 = vmatprep.mubr.msk.bf16.mxu1 %vm1424_vm8, %v2699_v61  ;;  %v3568_v59 = vpop.permute.xlu1 %1582 }
 0x520   :  { %1560 = vmatmul.mubr.bf16.gmra.mrb[20].mxu1 %v2701_v29  ;;  %v3566_v29 = vpop.permute.xlu0 %1574 }
 0x524   :  { %v3570_v22 = vpop.permute.xlu0 %1590 }
 0x5a8   :  { %v3526_v33 = vpop.f32.mrb[0].mxu0 }
 0x5a9   :  { %v3528_v55 = vpop.f32.mrb[1].mxu0 }
 0x5aa   :  { %v3530_v35 = vpop.f32.mrb[2].mxu0 }
 0x5ab   :  { %v3532_v36 = vpop.f32.mrb[3].mxu0 }
 0x5b0   :  { %v3534_v30 = vpop.f32.mrb[4].mxu0 }
 0x5b1   :  { %v3536_v37 = vpop.f32.mrb[5].mxu0 }
 0x5b2   :  { %v3538_v38 = vpop.f32.mrb[6].mxu0 }
 0x5b3   :  { %v3540_v44 = vpop.f32.mrb[7].mxu0 }
 0x5b8   :  { %v3542_v0 = vpop.f32.mrb[8].mxu0 }
 0x5b9   :  { %v3544_v46 = vpop.f32.mrb[9].mxu0 }
 0x5ba   :  { %v3546_v9 = vpop.f32.mrb[10].mxu0 }
 0x5bb   :  { %v3548_v39 = vpop.f32.mrb[11].mxu0 }
 0x5bc   :  { %4189 = vst [vmem:[#allocation41_spill] sm:$0xff] %v3548_v39 }
 0x5c0   :  { %v3550_v51 = vpop.f32.mrb[12].mxu0 }
 0x5c1   :  { %4190 = vst [vmem:[#allocation42_spill] sm:$0xff] %v3550_v51  ;;  %v3552_v47 = vpop.f32.mrb[13].mxu0 }
 0x5c2   :  { %v3554_v53 = vpop.f32.mrb[14].mxu0 }
 0x5c3   :  { %v3556_v2 = vpop.f32.mrb[15].mxu0 }
 0x5c4   :  { %4191 = vst [vmem:[#allocation43_spill] sm:$0xff] %v3556_v2 }
 0x5c8   :  { %v3558_v12 = vpop.f32.mrb[16].mxu0 }
 0x5c9   :  { %4192 = vst [vmem:[#allocation44_spill] sm:$0xff] %v3558_v12  ;;  %v3560_v18 = vpop.f32.mrb[17].mxu0 }
 0x5ca   :  { %v3562_v20 = vpop.f32.mrb[18].mxu0 }
 0x5cb   :  { %4193 = vst [vmem:[#allocation45_spill] sm:$0xff] %v3562_v20  ;;  %v3564_v6 = vpop.f32.mrb[19].mxu0  ;;  %v1521_v24 = vpop.f32.mrb[0].mxu1 }
 0x5cc   :  { %4194 = vst [vmem:[#allocation46_spill] sm:$0xff] %v3564_v6  ;;  %v1523_v25 = vpop.f32.mrb[1].mxu1 }
 0x5cd   :  { %v1524_v58 = vpop.f32.mrb[2].mxu1  ;;  %v3573_v25 = vadd.f32 %v3570_v22, %v1521_v24 }
 0x5ce   :  { %v1526_v1 = vpop.f32.mrb[3].mxu1 }
 0x5cf   :  { %v1642_v5 = vsel %vm137_vm0, %v3573_v25, -inf }
 0x5d0   :  { %v1489_v60 = vpop.f32.mrb[20].mxu0 }
 0x5d1   :  { %v1491_v61 = vpop.f32.mrb[21].mxu0 }
 0x5d2   :  { %v1492_v63 = vpop.f32.mrb[22].mxu0 }
 0x5d3   :  { %v1494_v32 = vpop.f32.mrb[23].mxu0  ;;  %v1529_v16 = vpop.f32.mrb[4].mxu1 }
 0x5d4   :  { %v1531_v34 = vpop.f32.mrb[5].mxu1  ;;  %v3578_v32 = vpop.permute.xlu1 %1598 }
 0x5d5   :  { %v1532_v54 = vpop.f32.mrb[6].mxu1 }
 0x5d6   :  { %v1534_v21 = vpop.f32.mrb[7].mxu1 }
 0x5d8   :  { %v1497_v15 = vpop.f32.mrb[24].mxu0 }
 0x5d9   :  { %v1499_v1 = vpop.f32.mrb[25].mxu0 }
 0x5da   :  { %v1500_v11 = vpop.f32.mrb[26].mxu0 }
 0x5db   :  { %v3576_v61 = vadd.f32 %v3570_v22, %v1500_v11  ;;  %v1502_v3 = vpop.f32.mrb[27].mxu0  ;;  %v1537_v19 = vpop.f32.mrb[8].mxu1  ;;  %v3588_v11 = vadd.f32 %v3578_v32, %v1524_v58 }
 0x5dc   :  { %v1539_v34 = vpop.f32.mrb[9].mxu1 }
 0x5dd   :  { %v1641_v21 = vsel %vm137_vm0, %v3576_v61, -inf  ;;  %v1540_v14 = vpop.f32.mrb[10].mxu1  ;;  %v1600_v34 = vadd.f32 %v1571_v23, %v1489_v60  ;;  %v1649_v58 = vsel %vm137_vm0, %v3588_v11, -inf }
 0x5de   :  { %v1643_v62 = vmax.f32 %v1641_v21, %v1642_v5  ;;  %v3585_v24 = vadd.f32 %v3570_v22, %v1540_v14  ;;  %v1542_v1 = vpop.f32.mrb[11].mxu1  ;;  %v1610_v5 = vadd.f32 %v1571_v23, %v1529_v16  ;;  %v1601_v16 = vadd.f32 %v3566_v29, %v1492_v63 }
 0x5df   :  { %v3616_v63 = vadd.f32 %v3568_v59, %v1537_v19 }
 0x5e0   :  { %v1644_v3 = vsel %vm137_vm0, %v3585_v24, -inf  ;;  %v1505_v13 = vpop.f32.mrb[28].mxu0 }
 0x5e1   :  { %v3592_v41 = vmax.f32 %v1643_v62, %v1644_v3  ;;  %v3595_v52 = vadd.f32 %v3578_v32, %v1505_v13  ;;  %v1507_v17 = vpop.f32.mrb[29].mxu0  ;;  %v1620_v13 = vsel %vm137_vm0, %v1600_v34, -inf }
 0x5e2   :  { %v1508_v45 = vpop.f32.mrb[30].mxu0 }
 0x5e3   :  { %v1648_v14 = vsel %vm137_vm0, %v3595_v52, -inf  ;;  %v1605_v21 = vadd.f32 %v1571_v23, %v1508_v45  ;;  %v1510_v1 = vpop.f32.mrb[31].mxu0  ;;  %v1545_v40 = vpop.f32.mrb[12].mxu1 }
 0x5e4   :  { %v1650_v28 = vmax.f32 %v1648_v14, %v1649_v58  ;;  %v3602_v60 = vadd.f32 %v3578_v32, %v1545_v40  ;;  %v1547_v62 = vpop.f32.mrb[13].mxu1  ;;  %v1623_v1 = vsel %vm137_vm0, %v1610_v5, -inf  ;;  %v1611_v14 = vadd.f32 %v3566_v29, %v1532_v54 }
 0x5e5   :  { %v1621_v17 = vsel %vm137_vm0, %v1605_v21, -inf  ;;  %v1548_v3 = vpop.f32.mrb[14].mxu1  ;;  %v1602_v40 = vadd.f32 %v3568_v59, %v1497_v15 }
 0x5e6   :  { %v1622_v48 = vmax.f32 %v1620_v13, %v1621_v17  ;;  %v1651_v42 = vsel %vm137_vm0, %v3602_v60, -inf  ;;  %v1615_v10 = vadd.f32 %v1571_v23, %v1548_v3  ;;  %v1550_v45 = vpop.f32.mrb[15].mxu1  ;;  %v1627_v23 = vsel %vm137_vm0, %v1601_v16, -inf }
 0x5e7   :  { %v3612_v58 = vmax.f32 %v1650_v28, %v1651_v42  ;;  %v1630_v54 = vsel %vm137_vm0, %v1611_v14, -inf  ;;  %v1634_v15 = vsel %vm137_vm0, %v1602_v40, -inf }
 0x5e8   :  { %v1624_v62 = vmax.f32 %v1622_v48, %v1623_v1  ;;  %v1625_v26 = vsel %vm137_vm0, %v1615_v10, -inf  ;;  %v1513_v49 = vpop.f32.mrb[32].mxu0 }
 0x5e9   :  { %v1606_v13 = vadd.f32 %v3566_v29, %v1513_v49  ;;  %v1515_v17 = vpop.f32.mrb[33].mxu0 }
 0x5ea   :  { %v1626_v3 = vmax.f32 %v1624_v62, %v1625_v26  ;;  %v1516_v45 = vpop.f32.mrb[34].mxu0  ;;  %v1637_v17 = vsel %vm137_vm0, %v3616_v63, -inf }
 0x5eb   :  { %v1628_v42 = vsel %vm137_vm0, %v1606_v13, -inf  ;;  %v1607_v28 = vadd.f32 %v3568_v59, %v1516_v45  ;;  %v1518_v48 = vpop.f32.mrb[35].mxu0  ;;  %v1553_v1 = vpop.f32.mrb[16].mxu1 }
 0x5ec   :  { %v1655_v4 = vsub.f32 %v1600_v34, %v1626_v3  ;;  %v1660_v19 = vsub.f32 %v1605_v21, %v1626_v3  ;;  %v1665_v20 = vsub.f32 %v1610_v5, %v1626_v3  ;;  %v1670_v51 = vsub.f32 %v1615_v10, %v1626_v3  ;;  %v1555_v49 = vpop.f32.mrb[17].mxu1 }
 0x5ed   :  { %v1629_v26 = vmax.f32 %v1627_v23, %v1628_v42  ;;  %v1635_v62 = vsel %vm137_vm0, %v1607_v28, -inf  ;;  %v1616_v39 = vadd.f32 %v3566_v29, %v1553_v1  ;;  %v1556_v31 = vpop.f32.mrb[18].mxu1 }
 0x5ee   :  { %v1675_v56 = vmul.f32 1.442695, %v1655_v4  ;;  %v1685_v6 = vmul.f32 1.442695, %v1660_v19  ;;  %v1695_v12 = vmul.f32 1.442695, %v1665_v20  ;;  %v1636_v45 = vmax.f32 %v1634_v15, %v1635_v62 }
 0x5ef   :  { %v1705_v48 = vmul.f32 1.442695, %v1670_v51  ;;  %v1631_v2 = vmax.f32 %v1629_v26, %v1630_v54  ;;  %v1632_v34 = vsel %vm137_vm0, %v1616_v39, -inf  ;;  %v1617_v10 = vadd.f32 %v3568_v59, %v1556_v31  ;;  %v1558_v5 = vpop.f32.mrb[19].mxu1 }
 0x5f0   :  { %2742 = vpow2.f32 %v1675_v56  ;;  %v1638_v21 = vmax.f32 %v1636_v45, %v1637_v17 }
 0x5f1   :  { %2744 = vpow2.f32 %v1685_v6  ;;  %v1633_v23 = vmax.f32 %v1631_v2, %v1632_v34  ;;  %v1639_v3 = vsel %vm137_vm0, %v1617_v10, -inf }
 0x5f2   :  { %2746 = vpow2.f32 %v1695_v12  ;;  %v1640_v29 = vmax.f32 %v1638_v21, %v1639_v3 }
 0x5f3   :  { %2748 = vpow2.f32 %v1705_v48  ;;  %v1656_v4 = vsub.f32 %v1601_v16, %v1633_v23  ;;  %v1661_v42 = vsub.f32 %v1606_v13, %v1633_v23  ;;  %v1666_v20 = vsub.f32 %v1611_v14, %v1633_v23  ;;  %v1561_v15 = vpop.f32.mrb[20].mxu1 }
 0x5f4   :  { %v1671_v51 = vsub.f32 %v1616_v39, %v1633_v23  ;;  %v1657_v54 = vsub.f32 %v1602_v40, %v1640_v29  ;;  %v1662_v1 = vsub.f32 %v1607_v28, %v1640_v29  ;;  %v1667_v19 = vsub.f32 %v3616_v63, %v1640_v29  ;;  %v1563_v59 = vpop.f32.mrb[21].mxu1 }
 0x5f5   :  { %v1677_v31 = vmul.f32 1.442695, %v1656_v4  ;;  %v1687_v56 = vmul.f32 1.442695, %v1661_v42  ;;  %v1697_v49 = vmul.f32 1.442695, %v1666_v20  ;;  %v1672_v6 = vsub.f32 %v1617_v10, %v1640_v29 }
 0x5f6   :  { %v1707_v2 = vmul.f32 1.442695, %v1671_v51  ;;  %v1618_v17 = vadd.f32 %v3570_v22, %v1561_v15  ;;  %v1679_v12 = vmul.f32 1.442695, %v1657_v54  ;;  %v1564_v26 = vpop.f32.mrb[22].mxu1 }
 0x5f7   :  { %2750 = vpow2.f32 %v1677_v31  ;;  %v1689_v16 = vmul.f32 1.442695, %v1662_v1  ;;  %v1619_v39 = vadd.f32 %v3578_v32, %v1564_v26  ;;  %v1566_v40 = vpop.f32.mrb[23].mxu1  ;;  %v1699_v63 = vmul.f32 1.442695, %v1667_v19 }
 0x5f8   :  { %2752 = vpow2.f32 %v1687_v56  ;;  %v1646_v14 = vsel %vm137_vm0, %v1618_v17, -inf  ;;  %v1709_v62 = vmul.f32 1.442695, %v1672_v6 }
 0x5f9   :  { %2754 = vpow2.f32 %v1697_v49  ;;  %v1647_v13 = vmax.f32 %v3592_v41, %v1646_v14  ;;  %v1653_v22 = vsel %vm137_vm0, %v1619_v39, -inf  ;;  %v3674_v14 = vpop.permute.xlu0 %1144 }
 0x5fa   :  { %v3636_v28 = vpop.eup %2742  ;;  %2756 = vpow2.f32 %v1707_v2  ;;  %v1654_v15 = vmax.f32 %v3612_v58, %v1653_v22 }
 0x5fb   :  { %v3639_v45 = vpop.eup %2744  ;;  %v1715_v48 = vsel %vm137_vm0, %v3636_v28, 0.0  ;;  %2758 = vpow2.f32 %v1679_v12  ;;  %v1658_v34 = vsub.f32 %v3576_v61, %v1647_v13  ;;  %v1663_v32 = vsub.f32 %v3573_v25, %v1647_v13 }
 0x5fc   :  { %v3645_v10 = vpop.eup %2746  ;;  %v1716_v41 = vsel %vm137_vm0, %v3639_v45, 0.0  ;;  %2760 = vpow2.f32 %v1689_v16  ;;  %v1668_v5 = vsub.f32 %v3585_v24, %v1647_v13  ;;  %v1673_v21 = vsub.f32 %v1618_v17, %v1647_v13 }
 0x5fd   :  { %v3650_v23 = vpop.eup %2748  ;;  %v1717_v3 = vadd.f32 %v1716_v41, %v1715_v48  ;;  %2762 = vpow2.f32 %v1699_v63  ;;  %v1681_v29 = vmul.f32 1.442695, %v1658_v34  ;;  %v1718_v4 = vsel %vm137_vm0, %v3645_v10, 0.0 }
 0x5fe   :  { %2764 = vpow2.f32 %v1709_v62  ;;  %v1691_v61 = vmul.f32 1.442695, %v1663_v32  ;;  %v1701_v25 = vmul.f32 1.442695, %v1668_v5  ;;  %v1711_v20 = vmul.f32 1.442695, %v1673_v21 }
 0x5ff   :  { %v1719_v42 = vadd.f32 %v1718_v4, %v1717_v3  ;;  %2766 = vpow2.f32 %v1681_v29  ;;  %v1720_v24 = vsel %vm137_vm0, %v3650_v23, 0.0  ;;  %v1659_v1 = vsub.f32 %v3595_v52, %v1654_v15 }
 0x600   :  { %2768 = vpow2.f32 %v1691_v61  ;;  %v1664_v19 = vsub.f32 %v3588_v11, %v1654_v15  ;;  %v1669_v58 = vsub.f32 %v3602_v60, %v1654_v15  ;;  %v1674_v56 = vsub.f32 %v1619_v39, %v1654_v15 }
 0x601   :  { %v3657_v51 = vpop.eup %2750  ;;  %v1721_v54 = vadd.f32 %v1720_v24, %v1719_v42  ;;  %2770 = vpow2.f32 %v1701_v25  ;;  %v1683_v2 = vmul.f32 1.442695, %v1659_v1  ;;  %v1216_v34 = vadd.f32 %v3528_v55, %v3674_v14 }
 0x602   :  { %v3661_v59 = vpop.eup %2752  ;;  %v1722_v31 = vsel %vm137_vm0, %v3657_v51, 0.0  ;;  %2772 = vpow2.f32 %v1711_v20  ;;  %v1693_v17 = vmul.f32 1.442695, %v1664_v19  ;;  %v1703_v12 = vmul.f32 1.442695, %v1669_v58 }
 0x603   :  { %v3666_v49 = vpop.eup %2754  ;;  %2774 = vrcp.f32 %v1721_v54  ;;  %v1723_v6 = vsel %vm137_vm0, %v3661_v59, 0.0  ;;  %v1713_v26 = vmul.f32 1.442695, %v1674_v56  ;;  %v1235_v21 = vadd.f32 %v3540_v44, %v3674_v14 }
 0x604   :  { %v3670_v52 = vpop.eup %2756  ;;  %v1724_v11 = vadd.f32 %v1723_v6, %v1722_v31  ;;  %v1725_v60 = vsel %vm137_vm0, %v3666_v49, 0.0  ;;  %2776 = vpow2.f32 %v1683_v2  ;;  %v1256_v3 = vadd.f32 %v3542_v0, %v3674_v14 }
 0x605   :  { %v3672_v16 = vpop.eup %2758  ;;  %2778 = vpow2.f32 %v1693_v17  ;;  %v1727_v62 = vsel %vm137_vm0, %v3670_v52, 0.0  ;;  %v3708_v42 = vadd.f32 %v3526_v33, %v3674_v14  ;;  %v1275_v44 = vadd.f32 %v3554_v53, %v3674_v14 }
 0x606   :  { %v3678_v39 = vpop.eup %2760  ;;  %v1726_v40 = vadd.f32 %v1725_v60, %v1724_v11  ;;  %v1729_v63 = vsel %vm137_vm0, %v3672_v16, 0.0  ;;  %2780 = vpow2.f32 %v1703_v12  ;;  %v1294_v24 = vmax.f32 %v1216_v34, 0.0 }
 0x607   :  { %v3682_v13 = vpop.eup %2762  ;;  %v1730_v22 = vsel %vm137_vm0, %v3678_v39, 0.0  ;;  %2782 = vpow2.f32 %v1713_v26  ;;  %v1219_v54 = vadd.f32 %v3532_v36, %v3674_v14  ;;  %v1240_v33 = vadd.f32 %v3534_v30, %v3674_v14 }
 0x608   :  { %v3688_v48 = vpop.eup %2764  ;;  %v1728_v32 = vadd.f32 %v1727_v62, %v1726_v40  ;;  %v1731_v41 = vadd.f32 %v1730_v22, %v1729_v63  ;;  %v1732_v29 = vsel %vm137_vm0, %v3682_v13, 0.0  ;;  %v1299_v58 = vmax.f32 %v1235_v21, 0.0 }
 0x609   :  { %v3692_v5 = vpop.eup %2766  ;;  %v1734_v0 = vsel %vm137_vm0, %v3688_v48, 0.0  ;;  %v1304_v53 = vmax.f32 %v1256_v3, 0.0  ;;  %v1309_v36 = vmax.f32 %v1275_v44, 0.0  ;;  %v3747_v21 = vadd.f32 %v3530_v35, %v3674_v14 }
 0x60a   :  { %v3700_v4 = vpop.eup %2768  ;;  %2784 = vrcp.f32 %v1728_v32  ;;  %v1733_v61 = vadd.f32 %v1732_v29, %v1731_v41  ;;  %v1736_v55 = vsel %vm137_vm0, %v3692_v5, 0.0  ;;  %v3741_v32 = vld [vmem:[#allocation4 + $0x50] sm:$0xff]  ;;  %v1295_v3 = vmax.f32 %v1219_v54, 0.0 }
 0x60b   :  { %v3704_v25 = vpop.eup %2770  ;;  %v1737_v20 = vsel %vm137_vm0, %v3700_v4, 0.0  ;;  %v1280_v35 = vadd.f32 %v3560_v18, %v3674_v14 }
 0x60c   :  { %v3716_v15 = vpop.eup %2772  ;;  %v1735_v1 = vadd.f32 %v1734_v0, %v1733_v61  ;;  %v1738_v19 = vadd.f32 %v1737_v20, %v1736_v55  ;;  %v1739_v56 = vsel %vm137_vm0, %v3704_v25, 0.0  ;;  %v1300_v55 = vmax.f32 %v1240_v33, 0.0 }
 0x60d   :  { %v2775_v31 = vpop.eup %2774  ;;  %v1741_v12 = vsel %vm137_vm0, %v3716_v15, 0.0 }
 0x60e   :  { %2786 = vrcp.f32 %v1735_v1  ;;  %v1740_v6 = vadd.f32 %v1739_v56, %v1738_v19  ;;  %v1760_v2 = vmul.f32 %v2775_v31, %v3639_v45  ;;  %v1755_v17 = vmul.f32 %v2775_v31, %v3636_v28  ;;  %v3726_v11 = vpop.eup %2776 }
 0x60f   :  { %v1770_v26 = vmul.f32 %v2775_v31, %v3650_v23  ;;  %v1765_v30 = vmul.f32 %v2775_v31, %v3645_v10  ;;  %v3732_v60 = vpop.eup %2778  ;;  %v1743_v63 = vsel %vm137_vm0, %v3726_v11, 0.0  ;;  %v1296_v28 = vmax.f32 %v3708_v42, 0.0 }
 0x610   :  { %v1742_v40 = vadd.f32 %v1741_v12, %v1740_v6  ;;  %v1780_v62 = vadd.f32 %v1760_v2, %v1299_v58  ;;  %v1775_v45 = vadd.f32 %v1755_v17, %v1294_v24  ;;  %v3736_v22 = vpop.eup %2780  ;;  %v1744_v34 = vsel %vm137_vm0, %v3732_v60, 0.0 }
 0x611   :  { %v1790_v23 = vadd.f32 %v1770_v26, %v1309_v36  ;;  %v1785_v41 = vadd.f32 %v1765_v30, %v1304_v53  ;;  %v3743_v10 = vpop.eup %2782  ;;  %v1745_v29 = vadd.f32 %v1744_v34, %v1743_v63  ;;  %v1746_v42 = vsel %vm137_vm0, %v3736_v22, 0.0  ;;  %v3777_v36 = vld [vmem:[#allocation4 + $0x58] sm:$0xff] }
 0x612   :  { %v1800_v61 = vmul.f32 %v1780_v62, %v3441_v43  ;;  %v1795_v44 = vmul.f32 %v1775_v45, %v3424_v27  ;;  %v1259_v24 = vadd.f32 %v3546_v9, %v3674_v14  ;;  %v3761_v43 = vld [vmem:[#allocation4 + $0x78] sm:$0xff]  ;;  %2788 = vrcp.f32 %v1742_v40 }
 0x613   :  { %v3754_v0 = vmul.f32 %v1790_v23, %v3486_v7  ;;  %v1747_v54 = vadd.f32 %v1746_v42, %v1745_v29  ;;  %v1748_v19 = vsel %vm137_vm0, %v3743_v10, 0.0  ;;  %v1243_v58 = vadd.f32 %v3538_v38, %v3674_v14  ;;  %v4196_v42 = vld [vmem:[#allocation44_spill] sm:$0xff] }
 0x614   :  { %v2785_v20 = vpop.eup %2784  ;;  %v1820_v1 = vmul.f32 %v1800_v61, %v3741_v32  ;;  %v1815_v27 = vmul.f32 %v1795_v44, %v3741_v32  ;;  %v2054_v56 = vmul.f32 %v1795_v44, %v3761_v43  ;;  %v1305_v17 = vmax.f32 %v1259_v24, 0.0  ;;  %v4197_v44 = vld [vmem:[#allocation46_spill] sm:$0xff] }
 0x615   :  { %v1756_v7 = vmul.f32 %v2785_v20, %v3657_v51  ;;  %v1749_v31 = vadd.f32 %v1748_v19, %v1747_v54  ;;  %v1830_v9 = vmul.f32 %v3754_v0, %v3741_v32  ;;  %v1761_v18 = vmul.f32 %v2785_v20, %v3661_v59 }
 0x616   :  { %v1850_v33 = vsel %vm137_vm0, %v1820_v1, 0.0  ;;  %v1835_v53 = vsel %vm137_vm0, %v1815_v27, 0.0  ;;  %v1264_v51 = vadd.f32 %v3552_v47, %v3674_v14  ;;  %v1310_v59 = vmax.f32 %v1280_v35, 0.0 }
 0x617   :  { %1851 = vadd.xlane.f32.xlu0 %v1850_v33  ;;  %v1776_v6 = vadd.f32 %v1756_v7, %v1295_v3  ;;  %2790 = vrcp.f32 %v1749_v31  ;;  %1836 = vadd.xlane.f32.xlu1 %v1835_v53  ;;  %v1781_v12 = vadd.f32 %v1761_v18, %v1300_v55  ;;  %v1766_v38 = vmul.f32 %v2785_v20, %v3666_v49 }
 0x618   :  { %v2787_v2 = vpop.eup %2786  ;;  %v1771_v30 = vmul.f32 %v2785_v20, %v3670_v52  ;;  %v1880_v40 = vsel %vm137_vm0, %v1830_v9, 0.0  ;;  %v1805_v62 = vmul.f32 %v1785_v41, %v3469_v57  ;;  %v2074_v45 = vsel %vm137_vm0, %v2054_v56, 0.0 }
 0x619   :  { %v1796_v26 = vmul.f32 %v1776_v6, %v3426_v8  ;;  %v1801_v63 = vmul.f32 %v1781_v12, %v3450_v50  ;;  %v1757_v47 = vmul.f32 %v2787_v2, %v3672_v16  ;;  %v2059_v23 = vmul.f32 %v1800_v61, %v3761_v43  ;;  %v4195_v16 = vld [vmem:[#allocation43_spill] sm:$0xff] }
 0x61a   :  { %v1786_v8 = vadd.f32 %v1766_v38, %v1305_v17  ;;  %v1232_v49 = vadd.f32 %v3536_v37, %v3674_v14  ;;  %v1301_v52 = vmax.f32 %v1243_v58, 0.0  ;;  %v1791_v3 = vadd.f32 %v1771_v30, %v1310_v59 }
 0x61b   :  { %1881 = vadd.xlane.f32.xlu0 %v1880_v40  ;;  %v1816_v34 = vmul.f32 %v1796_v26, %v3777_v36  ;;  %2075 = vadd.xlane.f32.xlu1 %v2074_v45  ;;  %v1777_v29 = vadd.f32 %v1757_v47, %v1296_v28  ;;  %v1248_v50 = vadd.f32 %v3544_v46, %v3674_v14  ;;  %v1306_v57 = vmax.f32 %v1264_v51, 0.0  ;;  %v3802_v28 = vld [vmem:[#allocation4 + $0x80] sm:$0xff] }
 0x61c   :  { %v1267_v41 = vadd.f32 %v4195_v16, %v3674_v14  ;;  %v1762_v55 = vmul.f32 %v2787_v2, %v3678_v39  ;;  %v1288_v61 = vadd.f32 %v4196_v42, %v3674_v14  ;;  %v1283_v20 = vadd.f32 %v4197_v44, %v3674_v14  ;;  %v2789_v35 = vpop.eup %2788  ;;  %v4198_v40 = vld [vmem:[#allocation33_spill] sm:$0xff] }
 0x61d   :  { %v1838_v37 = vsel %vm137_vm0, %v1816_v34, 0.0  ;;  %v1821_v24 = vmul.f32 %v1801_v63, %v3777_v36  ;;  %v2089_v46 = vsel %vm137_vm0, %v2059_v23, 0.0  ;;  %v1825_v54 = vmul.f32 %v1805_v62, %v3741_v32 }
 0x61e   :  { %v3806_v1 = vadd.f32 %v1762_v55, %v1301_v52  ;;  %v1767_v39 = vmul.f32 %v2787_v2, %v3682_v13  ;;  %v1297_v19 = vmax.f32 %v3747_v21, 0.0  ;;  %v1298_v27 = vmax.f32 %v1232_v49, 0.0  ;;  %v4202_v52 = vld [vmem:[#allocation45_spill] sm:$0xff] }
 0x61f   :  { %1839 = vadd.xlane.f32.xlu0 %v1838_v37  ;;  %2090 = vadd.xlane.f32.xlu1 %v2089_v46  ;;  %v2055_v7 = vmul.f32 %v1796_v26, %v3802_v28  ;;  %v1302_v9 = vmax.f32 %v1248_v50, 0.0  ;;  %v1307_v18 = vmax.f32 %v1267_v41, 0.0  ;;  %v1312_v58 = vmax.f32 %v1288_v61, 0.0  ;;  %v109_v41 = vld [vmem:[#allocation4 + $0x60] sm:$0xff] }
 0x620   :  { %v3811_v31 = vadd.f32 %v1767_v39, %v1306_v57  ;;  %v1853_v53 = vsel %vm137_vm0, %v1821_v24, 0.0  ;;  %v1311_v56 = vmax.f32 %v1283_v20, 0.0  ;;  %v1865_v32 = vsel %vm137_vm0, %v1825_v54, 0.0  ;;  %v4203_v57 = vld [vmem:[#allocation27_spill] sm:$0xff] }
 0x621   :  { %v2791_v33 = vpop.eup %2790  ;;  %v2064_v13 = vmul.f32 %v1805_v62, %v3761_v43  ;;  %v1758_v6 = vmul.f32 %v2789_v35, %v3692_v5  ;;  %v1763_v21 = vmul.f32 %v2789_v35, %v3700_v4  ;;  %v1772_v17 = vmul.f32 %v2787_v2, %v3688_v48  ;;  %v4199_v4 = vld [vmem:[#allocation38_spill] sm:$0xff] }
 0x622   :  { %v1768_v51 = vmul.f32 %v2789_v35, %v3704_v25  ;;  %v1759_v12 = vmul.f32 %v2791_v33, %v3726_v11  ;;  %v2077_v59 = vsel %vm137_vm0, %v2055_v7, 0.0  ;;  %v2060_v26 = vmul.f32 %v1801_v63, %v3802_v28  ;;  %v4200_v63 = vld [vmem:[#allocation41_spill] sm:$0xff] }
 0x623   :  { %1854 = vadd.xlane.f32.xlu0 %v1853_v53  ;;  %1866 = vadd.xlane.f32.xlu1 %v1865_v32  ;;  %v2069_v38 = vmul.f32 %v3754_v0, %v3761_v43  ;;  %v1778_v30 = vadd.f32 %v1758_v6, %v1297_v19  ;;  %v1806_v62 = vmul.f32 %v1786_v8, %v4198_v40  ;;  %v2104_v48 = vsel %vm137_vm0, %v2064_v13, 0.0  ;;  %v4201_v43 = vld [vmem:[#allocation42_spill] sm:$0xff]  ;;  %v4206_v32 = vld [vmem:[#allocation28_spill] sm:$0xff] }
 0x624   :  { %v1783_v5 = vadd.f32 %v1763_v21, %v1302_v9  ;;  %v1792_v47 = vadd.f32 %v1772_v17, %v1311_v56  ;;  %v3826_v45 = vadd.f32 %v1768_v51, %v1307_v18  ;;  %v1811_v25 = vmul.f32 %v1791_v3, %v4199_v4  ;;  %v4205_v18 = vld [vmem:[#allocation35_spill] sm:$0xff]  ;;  %v110_v13 = vld [vmem:[#allocation4 + $0x68] sm:$0xff] }
 0x625   :  { %v3830_v11 = vadd.f32 %v1759_v12, %v1298_v27  ;;  %v1773_v2 = vmul.f32 %v2789_v35, %v3716_v15  ;;  %v1251_v0 = vadd.f32 %v4200_v63, %v3674_v14  ;;  %v1272_v34 = vadd.f32 %v4201_v43, %v3674_v14  ;;  %v4204_v27 = vld [vmem:[#allocation30_spill] sm:$0xff]  ;;  %v115_v12 = vld [vmem:[#allocation4 + $0x90] sm:$0xff] }
 0x626   :  { %v2092_v8 = vsel %vm137_vm0, %v2060_v26, 0.0  ;;  %v1826_v49 = vmul.f32 %v1806_v62, %v3777_v36  ;;  %v1291_v3 = vadd.f32 %v4202_v52, %v3674_v14  ;;  %v2119_v50 = vsel %vm137_vm0, %v2069_v38, 0.0  ;;  %v4208_v38 = vld [vmem:[#allocation37_spill] sm:$0xff] }
 0x627   :  { %2078 = vadd.xlane.f32.xlu0 %v2077_v59  ;;  %2105 = vadd.xlane.f32.xlu1 %v2104_v48  ;;  %v3837_v23 = vadd.f32 %v1773_v2, %v1312_v58  ;;  %v1831_v15 = vmul.f32 %v1811_v25, %v3777_v36  ;;  %v1797_v16 = vmul.f32 %v1777_v29, %v4203_v57  ;;  %v1303_v55 = vmax.f32 %v1251_v0, 0.0  ;;  %v114_v29 = vld [vmem:[#allocation4 + $0x88] sm:$0xff]  ;;  %v116_v57 = vld [vmem:[#allocation4 + $0x98] sm:$0xff] }
 0x628   :  { %v1308_v42 = vmax.f32 %v1272_v34, 0.0  ;;  %v1868_v61 = vsel %vm137_vm0, %v1826_v49, 0.0  ;;  %v2065_v44 = vmul.f32 %v1806_v62, %v3802_v28  ;;  %v1769_v20 = vmul.f32 %v2791_v33, %v3736_v22  ;;  %v4209_v48 = vld [vmem:[#allocation34_spill] sm:$0xff] }
 0x629   :  { %v1764_v37 = vmul.f32 %v2791_v33, %v3732_v60  ;;  %v1313_v14 = vmax.f32 %v1291_v3, 0.0  ;;  %v1883_v24 = vsel %vm137_vm0, %v1831_v15, 0.0  ;;  %v1817_v35 = vmul.f32 %v1797_v16, %v109_v41 }
 0x62a   :  { %v1774_v36 = vmul.f32 %v2791_v33, %v3743_v10  ;;  %v1789_v46 = vadd.f32 %v1769_v20, %v1308_v42  ;;  %v2107_v19 = vsel %vm137_vm0, %v2065_v44, 0.0  ;;  %v2070_v22 = vmul.f32 %v1811_v25, %v3802_v28  ;;  %v4212_v44 = vld [vmem:[#allocation36_spill] sm:$0xff] }
 0x62b   :  { %2093 = vadd.xlane.f32.xlu0 %v2092_v8  ;;  %2120 = vadd.xlane.f32.xlu1 %v2119_v50  ;;  %v3852_v54 = vadd.f32 %v1764_v37, %v1303_v55  ;;  %v1802_v60 = vmul.f32 %v3806_v1, %v4204_v27  ;;  %v1841_v7 = vsel %vm137_vm0, %v1817_v35, 0.0  ;;  %v2056_v9 = vmul.f32 %v1797_v16, %v114_v29  ;;  %v4210_v8 = vld [vmem:[#allocation29_spill] sm:$0xff]  ;;  %v4211_v55 = vld [vmem:[#allocation40_spill] sm:$0xff] }
 0x62c   :  { %v3854_v39 = vadd.f32 %v1774_v36, %v1313_v14  ;;  %v1807_v10 = vmul.f32 %v3811_v31, %v4205_v18  ;;  %v2122_v33 = vsel %vm137_vm0, %v2070_v22, 0.0  ;;  %v1798_v28 = vmul.f32 %v1778_v30, %v4206_v32  ;;  %v4207_v31 = vld [vmem:[#allocation32_spill] sm:$0xff] }
 0x62d   :  { %v1822_v58 = vmul.f32 %v1802_v60, %v109_v41  ;;  %v2080_v53 = vsel %vm137_vm0, %v2056_v9, 0.0  ;;  %v2061_v6 = vmul.f32 %v1802_v60, %v114_v29  ;;  %v1803_v51 = vmul.f32 %v1783_v5, %v4207_v31 }
 0x62e   :  { %v1827_v56 = vmul.f32 %v1807_v10, %v109_v41  ;;  %v1818_v17 = vmul.f32 %v1798_v28, %v110_v13  ;;  %v2066_v26 = vmul.f32 %v1807_v10, %v114_v29  ;;  %v1812_v40 = vmul.f32 %v1792_v47, %v4208_v38 }
 0x62f   :  { %1869 = vadd.xlane.f32.xlu0 %v1868_v61  ;;  %1884 = vadd.xlane.f32.xlu1 %v1883_v24  ;;  %v1856_v1 = vsel %vm137_vm0, %v1822_v58, 0.0  ;;  %v2095_v59 = vsel %vm137_vm0, %v2061_v6, 0.0  ;;  %v2062_v62 = vmul.f32 %v1803_v51, %v115_v12  ;;  %v1808_v4 = vmul.f32 %v3826_v45, %v4209_v48  ;;  %v111_v45 = vld [vmem:[#allocation4 + $0x70] sm:$0xff] }
 0x630   :  { %v1871_v21 = vsel %vm137_vm0, %v1827_v56, 0.0  ;;  %v1844_v30 = vsel %vm137_vm0, %v1818_v17, 0.0  ;;  %v2110_v25 = vsel %vm137_vm0, %v2066_v26, 0.0  ;;  %v1832_v2 = vmul.f32 %v1812_v40, %v109_v41 }
 0x631   :  { %v2098_v5 = vsel %vm137_vm0, %v2062_v62, 0.0  ;;  %v1828_v63 = vmul.f32 %v1808_v4, %v110_v13  ;;  %v2071_v43 = vmul.f32 %v1812_v40, %v114_v29  ;;  %v2067_v34 = vmul.f32 %v1808_v4, %v115_v12 }
 0x632   :  { %v1886_v0 = vsel %vm137_vm0, %v1832_v2, 0.0  ;;  %v1799_v49 = vmul.f32 %v3830_v11, %v4210_v8  ;;  %v1823_v3 = vmul.f32 %v1803_v51, %v110_v13  ;;  %v2057_v41 = vmul.f32 %v1798_v28, %v115_v12 }
 0x633   :  { %2108 = vadd.xlane.f32.xlu0 %v2107_v19  ;;  %1842 = vadd.xlane.f32.xlu1 %v1841_v7  ;;  %v1874_v47 = vsel %vm137_vm0, %v1828_v63, 0.0  ;;  %v2125_v52 = vsel %vm137_vm0, %v2071_v43, 0.0  ;;  %v2113_v50 = vsel %vm137_vm0, %v2067_v34, 0.0  ;;  %v1813_v42 = vmul.f32 %v3837_v23, %v4211_v55  ;;  %v4213_v19 = vld [vmem:[#allocation31_spill] sm:$0xff] }
 0x634   :  { %v1819_v15 = vmul.f32 %v1799_v49, %v111_v45  ;;  %v1859_v16 = vsel %vm137_vm0, %v1823_v3, 0.0  ;;  %v2058_v61 = vmul.f32 %v1799_v49, %v116_v57  ;;  %v1809_v20 = vmul.f32 %v1789_v46, %v4212_v44  ;;  %v4214_v46 = vld [vmem:[#allocation39_spill] sm:$0xff]  ;;  %v4215_v49 = vld [vmem:[#allocation12_spill] sm:$0xff] }
 0x635   :  { %v2083_v37 = vsel %vm137_vm0, %v2057_v41, 0.0  ;;  %v1833_v14 = vmul.f32 %v1813_v42, %v110_v13  ;;  %v2072_v29 = vmul.f32 %v1813_v42, %v115_v12  ;;  %v1804_v23 = vmul.f32 %v3852_v54, %v4213_v19 }
 0x636   :  { %v1847_v11 = vsel %vm137_vm0, %v1819_v15, 0.0  ;;  %v2086_v24 = vsel %vm137_vm0, %v2058_v61, 0.0  ;;  %v1829_v35 = vmul.f32 %v1809_v20, %v111_v45  ;;  %v2068_v27 = vmul.f32 %v1809_v20, %v116_v57 }
 0x637   :  { %2123 = vadd.xlane.f32.xlu0 %v2122_v33  ;;  %2081 = vadd.xlane.f32.xlu1 %v2080_v53  ;;  %v1889_v36 = vsel %vm137_vm0, %v1833_v14, 0.0  ;;  %v1814_v60 = vmul.f32 %v3854_v39, %v4214_v46  ;;  %v2128_v7 = vsel %vm137_vm0, %v2072_v29, 0.0  ;;  %v1824_v9 = vmul.f32 %v1804_v23, %v111_v45 }
 0x638   :  { %v1877_v22 = vsel %vm137_vm0, %v1829_v35, 0.0  ;;  %v2116_v18 = vsel %vm137_vm0, %v2068_v27, 0.0  ;;  %v2063_v58 = vmul.f32 %v1804_v23, %v116_v57 }
 0x639   :  { %v1834_v10 = vmul.f32 %v1814_v60, %v111_v45  ;;  %v1862_v33 = vsel %vm137_vm0, %v1824_v9, 0.0  ;;  %v2073_v56 = vmul.f32 %v1814_v60, %v116_v57 }
 0x63a   :  { %v2101_v53 = vsel %vm137_vm0, %v2063_v58, 0.0 }
 0x63b   :  { %1857 = vadd.xlane.f32.xlu0 %v1856_v1  ;;  %1872 = vadd.xlane.f32.xlu1 %v1871_v21  ;;  %v1892_v54 = vsel %vm137_vm0, %v1834_v10, 0.0  ;;  %v2131_v39 = vsel %vm137_vm0, %v2073_v56, 0.0 }
 0x63f   :  { %2096 = vadd.xlane.f32.xlu0 %v2095_v59  ;;  %1845 = vadd.xlane.f32.xlu1 %v1844_v30 }
 0x643   :  { %2111 = vadd.xlane.f32.xlu0 %v2110_v25  ;;  %2099 = vadd.xlane.f32.xlu1 %v2098_v5 }
 0x647   :  { %1887 = vadd.xlane.f32.xlu0 %v1886_v0  ;;  %1875 = vadd.xlane.f32.xlu1 %v1874_v47 }
 0x64b   :  { %2126 = vadd.xlane.f32.xlu0 %v2125_v52  ;;  %2114 = vadd.xlane.f32.xlu1 %v2113_v50 }
 0x64f   :  { %1860 = vadd.xlane.f32.xlu0 %v1859_v16  ;;  %1848 = vadd.xlane.f32.xlu1 %v1847_v11 }
 0x653   :  { %2084 = vadd.xlane.f32.xlu0 %v2083_v37  ;;  %2087 = vadd.xlane.f32.xlu1 %v2086_v24 }
 0x657   :  { %1890 = vadd.xlane.f32.xlu0 %v1889_v36  ;;  %1878 = vadd.xlane.f32.xlu1 %v1877_v22 }
 0x65b   :  { %2129 = vadd.xlane.f32.xlu0 %v2128_v7  ;;  %2117 = vadd.xlane.f32.xlu1 %v2116_v18 }
 0x65f   :  { %1863 = vadd.xlane.f32.xlu0 %v1862_v33  ;;  %1893 = vadd.xlane.f32.xlu1 %v1892_v54 }
 0x663   :  { %2102 = vadd.xlane.f32.xlu0 %v2101_v53 }
 0x667   :  { %2132 = vadd.xlane.f32.xlu0 %v2131_v39 }
 0x6a4   :  { %v3901_v32 = vpop.xlane.xlu0 %1851  ;;  %v1837_v28 = vpop.xlane.xlu1 %1836 }
 0x6a5   :  { %v1918_v50 = vrot.slane %v1837_v28, %v4215_v49 }
 0x6a8   :  { %v3903_v13 = vpop.xlane.xlu0 %1881  ;;  %v2076_v1 = vpop.xlane.xlu1 %2075 }
 0x6a9   :  { %v2157_v44 = vrot.slane %v2076_v1, %v4215_v49 }
 0x6ac   :  { %v1840_v6 = vpop.xlane.xlu0 %1839  ;;  %v3905_v21 = vpop.xlane.xlu1 %2090 }
 0x6ad   :  { %v1922_v45 = vrot.slane %v1840_v6, %v4215_v49 }
 0x6af   :  { %v1995_v16 = vsel %vm300_vm1, %v1922_v45, %v1918_v50 }
 0x6b0   :  { %v3907_v17 = vpop.xlane.xlu0 %1854  ;;  %v1867_v31 = vpop.xlane.xlu1 %1866 }
 0x6b1   :  { %v1958_v46 = vrot.slane %v1867_v31, %v4215_v49  ;;  %v1942_v39 = vrot.slane %v3907_v17, %v4215_v49 }
 0x6b4   :  { %v2079_v51 = vpop.xlane.xlu0 %2078  ;;  %v3909_v12 = vpop.xlane.xlu1 %2105 }
 0x6b5   :  { %v2161_v41 = vrot.slane %v2079_v51, %v4215_v49 }
 0x6b7   :  { %v2234_v24 = vsel %vm300_vm1, %v2161_v41, %v2157_v44 }
 0x6b8   :  { %v3911_v59 = vpop.xlane.xlu0 %2093  ;;  %v3913_v26 = vpop.xlane.xlu1 %2120 }
 0x6bc   :  { %v1870_v38 = vpop.xlane.xlu0 %1869  ;;  %v3915_v40 = vpop.xlane.xlu1 %1884 }
 0x6bd   :  { %v1962_v35 = vrot.slane %v1870_v38, %v4215_v49  ;;  %v1982_v28 = vrot.slane %v3915_v40, %v4215_v49 }
 0x6bf   :  { %v2003_v10 = vsel %vm300_vm1, %v1962_v35, %v1958_v46 }
 0x6c0   :  { %v3917_v30 = vpop.xlane.xlu0 %2108  ;;  %v1843_v62 = vpop.xlane.xlu1 %1842 }
 0x6c1   :  { %v1926_v3 = vrot.slane %v1843_v62, %v4215_v49  ;;  %v1938_v62 = vrot.slane %v3901_v32, %v4215_v49 }
 0x6c3   :  { %v1996_v42 = vsel %vm302_vm2, %v1926_v3, %v1995_v16 }
 0x6c4   :  { %v3919_v48 = vpop.xlane.xlu0 %2123  ;;  %v2082_v4 = vpop.xlane.xlu1 %2081 }
 0x6c5   :  { %v2165_v11 = vrot.slane %v2082_v4, %v4215_v49  ;;  %v1978_v4 = vrot.slane %v3903_v13, %v4215_v49  ;;  %v2201_v13 = vrot.slane %v3917_v30, %v4215_v49  ;;  %v2197_v30 = vrot.slane %v3909_v12, %v4215_v49 }
 0x6c7   :  { %v2235_v23 = vsel %vm302_vm2, %v2165_v11, %v2234_v24  ;;  %v2007_v32 = vsel %vm300_vm1, %v1982_v28, %v1978_v4  ;;  %v2221_v24 = vrot.slane %v3919_v48, %v4215_v49 }
 0x6c8   :  { %v3921_v25 = vpop.xlane.xlu0 %1857  ;;  %v1873_v2 = vpop.xlane.xlu1 %1872 }
 0x6c9   :  { %v1966_v22 = vrot.slane %v1873_v2, %v4215_v49  ;;  %v1946_v31 = vrot.slane %v3921_v25, %v4215_v49  ;;  %v2177_v25 = vrot.slane %v3905_v21, %v4215_v49 }
 0x6cb   :  { %v2004_v54 = vsel %vm302_vm2, %v1966_v22, %v2003_v10 }
 0x6cc   :  { %v3923_v5 = vpop.xlane.xlu0 %2096  ;;  %v1846_v63 = vpop.xlane.xlu1 %1845 }
 0x6cd   :  { %v1930_v15 = vrot.slane %v1846_v63, %v4215_v49  ;;  %v1999_v63 = vsel %vm300_vm1, %v1942_v39, %v1938_v62  ;;  %v2185_v3 = vrot.slane %v3923_v5, %v4215_v49 }
 0x6cf   :  { %v1997_v20 = vsel %vm304_vm3, %v1930_v15, %v1996_v42 }
 0x6d0   :  { %v3925_v0 = vpop.xlane.xlu0 %2111  ;;  %v3927_v43 = vpop.xlane.xlu1 %2099 }
 0x6d1   :  { %v2189_v21 = vrot.slane %v3927_v43, %v4215_v49  ;;  %v2205_v41 = vrot.slane %v3925_v0, %v4215_v49 }
 0x6d4   :  { %v3929_v47 = vpop.xlane.xlu0 %1887  ;;  %v1876_v34 = vpop.xlane.xlu1 %1875 }
 0x6d5   :  { %v1970_v60 = vrot.slane %v1876_v34, %v4215_v49  ;;  %v1986_v17 = vrot.slane %v3929_v47, %v4215_v49  ;;  %v2181_v34 = vrot.slane %v3911_v59, %v4215_v49  ;;  %v2000_v47 = vsel %vm302_vm2, %v1946_v31, %v1999_v63 }
 0x6d7   :  { %v2005_v56 = vsel %vm304_vm3, %v1970_v60, %v2004_v54  ;;  %v2238_v42 = vsel %vm300_vm1, %v2181_v34, %v2177_v25 }
 0x6d8   :  { %v3931_v8 = vpop.xlane.xlu0 %2126  ;;  %v3934_v52 = vpop.xlane.xlu1 %2114 }
 0x6d9   :  { %v2209_v43 = vrot.slane %v3934_v52, %v4215_v49 }
 0x6dc   :  { %v1861_v57 = vpop.xlane.xlu0 %1860  ;;  %v1849_v55 = vpop.xlane.xlu1 %1848 }
 0x6dd   :  { %v1934_v61 = vrot.slane %v1849_v55, %v4215_v49  ;;  %v1950_v40 = vrot.slane %v1861_v57, %v4215_v49  ;;  %v2008_v57 = vsel %vm302_vm2, %v1986_v17, %v2007_v32 }
 0x6df   :  { %v1998_v14 = vsel %vm306_vm4, %v1934_v61, %v1997_v20  ;;  %v2001_v16 = vsel %vm304_vm3, %v1950_v40, %v2000_v47  ;;  %v2239_v20 = vsel %vm302_vm2, %v2185_v3, %v2238_v42  ;;  %v4216_v3 = vld [vmem:[#allocation15_spill] sm:$0xff]  ;;  %v4225_v42 = vmov 0  }
 0x6e0   :  { %v2085_v37 = vpop.xlane.xlu0 %2084  ;;  %v2088_v29 = vpop.xlane.xlu1 %2087  ;;  %v2015_v19 = vsel %vm324_vm5, %v1998_v14, 0.0  ;;  %v2242_v14 = vsel %vm300_vm1, %v2201_v13, %v2197_v30  ;;  %v2240_v52 = vsel %vm304_vm3, %v2189_v21, %v2239_v20  ;;  %v4219_v21 = vld [vmem:[#allocation21_spill] sm:$0xff]  ;;  %v4223_v30 = vld [vmem:[#allocation23_spill] sm:$0xff] }
 0x6e1   :  { %v2169_v36 = vrot.slane %v2085_v37, %v4215_v49  ;;  %v2173_v27 = vrot.slane %v2088_v29, %v4215_v49  ;;  %2016 = vadd.xlane.f32.xlu1 %v2015_v19  ;;  %v2243_v35 = vsel %vm302_vm2, %v2205_v41, %v2242_v14  ;;  %v2217_v19 = vrot.slane %v3913_v26, %v4215_v49  ;;  %v4224_v41 = vld [vmem:[#allocation22_spill] sm:$0xff] }
 0x6e2   :  { %v2244_v48 = vsel %vm304_vm3, %v2209_v43, %v2243_v35 }
 0x6e3   :  { %v2236_v7 = vsel %vm304_vm3, %v2169_v36, %v2235_v23  ;;  %v2225_v36 = vrot.slane %v3931_v8, %v4215_v49 }
 0x6e4   :  { %v1891_v9 = vpop.xlane.xlu0 %1890  ;;  %v2237_v18 = vsel %vm306_vm4, %v2173_v27, %v2236_v7  ;;  %v1879_v33 = vpop.xlane.xlu1 %1878  ;;  %v2246_v7 = vsel %vm300_vm1, %v2221_v24, %v2217_v19 }
 0x6e5   :  { %v2254_v58 = vsel %vm324_vm5, %v2237_v18, 0.0  ;;  %v1974_v53 = vrot.slane %v1879_v33, %v4215_v49  ;;  %v1990_v2 = vrot.slane %v1891_v9, %v4215_v49  ;;  %v2247_v8 = vsel %vm302_vm2, %v2225_v36, %v2246_v7 }
 0x6e6   :  { %2255 = vadd.xlane.f32.xlu1 %v2254_v58 }
 0x6e7   :  { %v2006_v6 = vsel %vm306_vm4, %v1974_v53, %v2005_v56  ;;  %v2009_v55 = vsel %vm304_vm3, %v1990_v2, %v2008_v57  ;;  %v4220_v57 = vld [vmem:[#allocation16_spill] sm:$0xff] }
 0x6e8   :  { %v2130_v1 = vpop.xlane.xlu0 %2129  ;;  %v2118_v51 = vpop.xlane.xlu1 %2117  ;;  %v2021_v38 = vsel %vm324_vm5, %v2006_v6, 0.0 }
 0x6e9   :  { %v2213_v12 = vrot.slane %v2118_v51, %v4215_v49  ;;  %v2229_v23 = vrot.slane %v2130_v1, %v4215_v49 }
 0x6ea   :  { %2022 = vadd.xlane.f32.xlu1 %v2021_v38 }
 0x6eb   :  { %v2245_v60 = vsel %vm306_vm4, %v2213_v12, %v2244_v48  ;;  %v2248_v26 = vsel %vm304_vm3, %v2229_v23, %v2247_v8 }
 0x6ec   :  { %v1864_v45 = vpop.xlane.xlu0 %1863  ;;  %v1894_v15 = vpop.xlane.xlu1 %1893  ;;  %v2260_v9 = vsel %vm324_vm5, %v2245_v60, 0.0 }
 0x6ed   :  { %v1954_v50 = vrot.slane %v1864_v45, %v4215_v49  ;;  %v1994_v59 = vrot.slane %v1894_v15, %v4215_v49  ;;  %v4218_v15 = vld [vmem:[#allocation17_spill] sm:$0xff] }
 0x6ef   :  { %v2002_v5 = vsel %vm306_vm4, %v1954_v50, %v2001_v16  ;;  %v2010_v44 = vsel %vm306_vm4, %v1994_v59, %v2009_v55  ;;  %v4217_v50 = vld [vmem:[#allocation18_spill] sm:$0xff]  ;;  %v4221_v59 = vld [vmem:[#allocation20_spill] sm:$0xff]  ;;  %v4222_v16 = vld [vmem:[#allocation19_spill] sm:$0xff] }
 0x6f0   :  { %v2103_v11 = vpop.xlane.xlu0 %2102  ;;  %v2018_v61 = vsel %vm324_vm5, %v2002_v5, 0.0  ;;  %v2024_v37 = vsel %vm324_vm5, %v2010_v44, 0.0  ;;  %v2946_v5 = vmov 1   ;;  %v4060_v55 = vld [vmem:[%s4116_s1] sm:$0xff]  ;;  %s2947_s1 = smov 1  }
 0x6f1   :  { %v2193_v0 = vrot.slane %v2103_v11, %v4215_v49  ;;  %2019 = vadd.xlane.f32.xlu0 %v2018_v61  ;;  %2025 = vadd.xlane.f32.xlu1 %v2024_v37 }
 0x6f3   :  { %v2241_v29 = vsel %vm306_vm4, %v2193_v0, %v2240_v52 }
 0x6f4   :  { %v2133_v22 = vpop.xlane.xlu0 %2132  ;;  %v2257_v27 = vsel %vm324_vm5, %v2241_v29, 0.0 }
 0x6f5   :  { %v2233_v46 = vrot.slane %v2133_v22, %v4215_v49  ;;  %2258 = vadd.xlane.f32.xlu0 %v2257_v27 }
 0x6f7   :  { %v2249_v18 = vsel %vm306_vm4, %v2233_v46, %v2248_v26 }
 0x6f8   :  { %v2263_v10 = vsel %vm324_vm5, %v2249_v18, 0.0 }
 0x6f9   :  { %2261 = vadd.xlane.f32.xlu0 %v2260_v9 }
 0x6fd   :  { %2264 = vadd.xlane.f32.xlu0 %v2263_v10 }
 0x76e   :  { %v2017_v33 = vpop.xlane.xlu1 %2016 }
 0x76f   :  { %v2034_v56 = vrot.slane %v2017_v33, %v4215_v49 }
 0x773   :  { %v2256_v58 = vpop.xlane.xlu1 %2255 }
 0x774   :  { %v2273_v25 = vrot.slane %v2256_v58, %v4215_v49 }
 0x777   :  { %v2023_v54 = vpop.xlane.xlu1 %2022 }
 0x778   :  { %v2042_v1 = vrot.slane %v2023_v54, %v4215_v49 }
 0x77e   :  { %v2020_v53 = vpop.xlane.xlu0 %2019  ;;  %v2026_v28 = vpop.xlane.xlu1 %2025 }
 0x77f   :  { %v2038_v39 = vrot.slane %v2020_v53, %v4215_v49  ;;  %v2046_v31 = vrot.slane %v2026_v28, %v4215_v49  ;;  %v4226_v28 = vld [vmem:[#allocation14_spill] sm:$0xff] }
 0x781   :  { %v2047_v6 = vsel %vm300_vm1, %v2038_v39, %v2034_v56 }
 0x782   :  { %v2259_v51 = vpop.xlane.xlu0 %2258  ;;  %v2048_v38 = vsel %vm302_vm2, %v2042_v1, %v2047_v6  ;;  %v4227_v6 = vld [vmem:[#allocation13_spill] sm:$0xff] }
 0x783   :  { %v2049_v62 = vsel %vm304_vm3, %v2046_v31, %v2048_v38  ;;  %v2277_v40 = vrot.slane %v2259_v51, %v4215_v49  ;;  %v4228_v51 = vld [vmem:[#allocation25_spill] sm:$0xff] }
 0x784   :  { %v2051_v4 = vsel %vm661_vm6, %v2049_v62, 0.0  ;;  %v4229_v62 = vld [vmem:[#allocation26_spill] sm:$0xff] }
 0x785   :  { %2052 = vadd.xlane.f32.xlu1 %v2051_v4  ;;  %v2286_v34 = vsel %vm300_vm1, %v2277_v40, %v2273_v25  ;;  %v2341_v40 = vmul.f32 1.442695, %v4218_v15  ;;  %v2343_v25 = vmul.f32 1.442695, %v4219_v21 }
 0x786   :  { %v2262_v17 = vpop.xlane.xlu0 %2261 }
 0x787   :  { %v2281_v2 = vrot.slane %v2262_v17, %v4215_v49  ;;  %v2333_v17 = vmul.f32 1.442695, %v4220_v57 }
 0x789   :  { %v2287_v45 = vsel %vm302_vm2, %v2281_v2, %v2286_v34  ;;  %2792 = vpow2.f32 %v2333_v17  ;;  %v2335_v2 = vmul.f32 1.442695, %v4217_v50  ;;  %v2347_v34 = vmul.f32 1.442695, %v4223_v30 }
 0x78a   :  { %v2265_v63 = vpop.xlane.xlu0 %2264  ;;  %2794 = vpow2.f32 %v2341_v40 }
 0x78b   :  { %v2285_v32 = vrot.slane %v2265_v63, %v4215_v49  ;;  %2796 = vpow2.f32 %v2335_v2  ;;  %v2339_v63 = vmul.f32 1.442695, %v4224_v41 }
 0x78c   :  { %2798 = vpow2.f32 %v2343_v25 }
 0x78d   :  { %v2288_v13 = vsel %vm304_vm3, %v2285_v32, %v2287_v45  ;;  %2800 = vpow2.f32 %v2339_v63 }
 0x78e   :  { %v2290_v47 = vsel %vm661_vm6, %v2288_v13, 0.0  ;;  %2802 = vpow2.f32 %v2347_v34 }
 0x78f   :  { %2291 = vadd.xlane.f32.xlu0 %v2290_v47 }
 0x793   :  { %v2793_v32 = vpop.eup %2792 }
 0x794   :  { %v2795_v45 = vpop.eup %2794 }
 0x795   :  { %v2797_v13 = vpop.eup %2796  ;;  %v2349_v47 = vadd.f32 %v2795_v45, %v2793_v32 }
 0x796   :  { %2295 = vrot.lane.b32.xlu1 %v4216_v3, %s2945_s18  ;;  %v2799_v3 = vpop.eup %2798 }
 0x797   :  { %2804 = vlog2.f32 %v2349_v47 }
 0x79a   :  { %2374 = vperm.xlu1 %2665, %v4217_v50  }
 0x79e   :  { %2412 = vperm.xlu1 %2665, %v4218_v15   ;;  %v2350_v15 = vadd.f32 %v2799_v3, %v2797_v13 }
 0x7a0   :  { %2806 = vlog2.f32 %v2350_v15 }
 0x7a2   :  { %2415 = vperm.xlu1 %2665, %v4219_v21  }
 0x7a5   :  { %2371 = vperm.xlu0 %2666, %v4220_v57   ;;  %v2801_v57 = vpop.eup %2800 }
 0x7a6   :  { %2418 = vperm.xlu1 %2665, %v4221_v59   ;;  %v2803_v50 = vpop.eup %2802 }
 0x7a7   :  { %v2805_v21 = vpop.eup %2804 }
 0x7a9   :  { %2377 = vperm.xlu0 %2666, %v4222_v16  }
 0x7aa   :  { %2421 = vperm.xlu1 %2665, %v4223_v30  }
 0x7ad   :  { %2380 = vperm.xlu0 %2666, %v4224_v41   ;;  %v2337_v41 = vmul.f32 1.442695, %v4222_v16 }
 0x7ae   :  { %2667 = vset.pattern.permute.xlu1 %v2946_v5  ;;  %v2352_v5 = vadd.f32 %v2803_v50, %v2801_v57 }
 0x7af   :  { %2404 = vperm.xlu1 %2667, %v4060_v55  }
 0x7b0   :  { %2808 = vlog2.f32 %v2352_v5 }
 0x7b1   :  { %2363 = vperm.xlu0 %2666, %v4060_v55   ;;  %2810 = vpow2.f32 %v2337_v41 }
 0x7b3   :  { %2668 = vset.pattern.permute.xlu1 %v4225_v42  ;;  %v2354_v42 = vmul.f32 0.6931472, %v2805_v21 }
 0x812   :  { %v2053_v43 = vpop.xlane.xlu1 %2052 }
 0x816   :  { %v2296_v11 = vpop.permute.xlu1 %2295 }
 0x81a   :  { %v2375_v61 = vpop.permute.xlu1 %2374 }
 0x81b   :  { %v2389_v48 = vrot.slane %v2375_v61, %v4215_v49 }
 0x81c   :  { %v2292_v44 = vpop.xlane.xlu0 %2291 }
 0x81d   :  { %v2294_v20 = vsel %vm2293_vm9, %v2053_v43, %v2292_v44  ;;  %v2807_v43 = vpop.eup %2806 }
 0x81e   :  { %v4066_v12 = vadd.f32 %v2296_v11, %v2294_v20  ;;  %v2413_v0 = vpop.permute.xlu1 %2412  ;;  %v2345_v11 = vmul.f32 1.442695, %v4221_v59  ;;  %v2356_v44 = vmul.f32 0.6931472, %v2807_v43 }
 0x81f   :  { %v2426_v23 = vrot.slane %v2413_v0, %v4215_v49 }
 0x820   :  { %v2300_v37 = vsel %vm2299_vm10, %v4066_v12, -inf  ;;  %2812 = vpow2.f32 %v2345_v11 }
 0x821   :  { %2301 = vmax.xlane.f32.xlu0 %v2300_v37 }
 0x822   :  { %v2416_v14 = vpop.permute.xlu1 %2415 }
 0x823   :  { %v2430_v35 = vrot.slane %v2416_v14, %v4215_v49 }
 0x824   :  { %v2372_v24 = vpop.permute.xlu0 %2371 }
 0x825   :  { %v2385_v29 = vrot.slane %v2372_v24, %v4215_v49  ;;  %v2439_v60 = vsel %vm300_vm1, %v2430_v35, %v2426_v23  ;;  %v2809_v24 = vpop.eup %2808 }
 0x826   :  { %v2419_v52 = vpop.permute.xlu1 %2418 }
 0x827   :  { %v2434_v19 = vrot.slane %v2419_v52, %v4215_v49  ;;  %v2398_v8 = vsel %vm300_vm1, %v2389_v48, %v2385_v29 }
 0x828   :  { %v2378_v36 = vpop.permute.xlu0 %2377 }
 0x829   :  { %v2393_v22 = vrot.slane %v2378_v36, %v4215_v49  ;;  %v2440_v26 = vsel %vm302_vm2, %v2434_v19, %v2439_v60  ;;  %v2360_v36 = vmul.f32 0.6931472, %v2809_v24  ;;  %v2811_v19 = vpop.eup %2810 }
 0x82a   :  { %v2422_v27 = vpop.permute.xlu1 %2421  ;;  %v2813_v59 = vpop.eup %2812 }
 0x82b   :  { %v2438_v46 = vrot.slane %v2422_v27, %v4215_v49  ;;  %v2399_v33 = vsel %vm302_vm2, %v2393_v22, %v2398_v8  ;;  %v2351_v23 = vadd.f32 %v2813_v59, %v2811_v19 }
 0x82c   :  { %v2381_v7 = vpop.permute.xlu0 %2380 }
 0x82d   :  { %v2397_v9 = vrot.slane %v2381_v7, %v4215_v49  ;;  %v2441_v18 = vsel %vm304_vm3, %v2438_v46, %v2440_v26 }
 0x82e   :  { %v2405_v10 = vpop.permute.xlu1 %2404 }
 0x82f   :  { %v2400_v58 = vsel %vm304_vm3, %v2397_v9, %v2399_v33  ;;  %v2443_v53 = vmul.f32 %v2441_v18, %v2405_v10 }
 0x830   :  { %v2364_v54 = vpop.permute.xlu0 %2363 }
 0x831   :  { %v2402_v56 = vmul.f32 %v2400_v58, %v2364_v54 }
 0x833   :  { %v2444_v39 = vadd.f32 %v2443_v53, %v2402_v56 }
 0x835   :  { %v2449_v1 = vrot.slane %v2444_v39, %v4226_v28  ;;  %v2456_v31 = vrot.slane %v2444_v39, %v4227_v6  ;;  %v2463_v38 = vrot.slane %v2444_v39, %v4228_v51  ;;  %v2470_v4 = vrot.slane %v2444_v39, %v4229_v62  ;;  %v4230_v62 = vld [vmem:[#allocation24_spill] sm:$0xff] }
 0x837   :  { %2451 = vbcast.lane.b32.xlu1 %v2449_v1, 256 }
 0x83b   :  { %2458 = vbcast.lane.b32.xlu1 %v2456_v31, 256 }
 0x83f   :  { %2465 = vbcast.lane.b32.xlu1 %v2463_v38, 256 }
 0x843   :  { %2472 = vbcast.lane.b32.xlu1 %v2470_v4, 256  ;;  %v662_v4 = vsel %vm661_vm6, %v4230_v62, 0.0 }
 0x8a9   :  { %v2452_v30 = vpop.permute.xlu1 %2451 }
 0x8aa   :  { %v2478_v61 = vsub.f32 %v2354_v42, %v2452_v30 }
 0x8ac   :  { %2487 = vperm.xlu0 %2666, %v2478_v61  }
 0x8ad   :  { %v2459_v20 = vpop.permute.xlu1 %2458 }
 0x8ae   :  { %v2479_v0 = vsub.f32 %v2356_v44, %v2459_v20  ;;  %v2302_v37 = vpop.xlane.xlu0 %2301 }
 0x8af   :  { %v2303_v14 = vsub.f32 %v4066_v12, %v2302_v37 }
 0x8b0   :  { %2490 = vperm.xlu0 %2666, %v2479_v0  }
 0x8b1   :  { %v2304_v52 = vmul.f32 1.442695, %v2303_v14  ;;  %v2466_v35 = vpop.permute.xlu1 %2465 }
 0x8b3   :  { %2814 = vpow2.f32 %v2304_v52 }
 0x8b4   :  { %2816 = vlog2.f32 %v2351_v23 }
 0x8b5   :  { %v2473_v16 = vpop.permute.xlu1 %2472 }
 0x8b6   :  { %v2481_v29 = vsub.f32 %v2360_v36, %v2473_v16 }
 0x8b8   :  { %2496 = vperm.xlu0 %2666, %v2481_v29  }
 0x8bd   :  { %v2815_v22 = vpop.eup %2814 }
 0x8be   :  { %v2306_v27 = vsel %vm2299_vm10, %v2815_v22, 0.0  ;;  %v2817_v48 = vpop.eup %2816 }
 0x8bf   :  { %2307 = vadd.xlane.f32.xlu1 %v2306_v27  ;;  %v2358_v46 = vmul.f32 0.6931472, %v2817_v48 }
 0x8c1   :  { %v2480_v12 = vsub.f32 %v2358_v46, %v2466_v35 }
 0x8d0   :  { %2493 = vperm.xlu1 %2668, %v2480_v12  }
 0x92b   :  { %v2488_v8 = vpop.permute.xlu0 %2487 }
 0x92c   :  { %v2501_v56 = vrot.slane %v2488_v8, %v4215_v49 }
 0x92f   :  { %v2491_v33 = vpop.permute.xlu0 %2490 }
 0x930   :  { %v2505_v54 = vrot.slane %v2491_v33, %v4215_v49 }
 0x932   :  { %v2514_v28 = vsel %vm300_vm1, %v2505_v54, %v2501_v56 }
 0x937   :  { %v2497_v39 = vpop.permute.xlu0 %2496 }
 0x94c   :  { %v2308_v60 = vpop.xlane.xlu1 %2307 }
 0x94d   :  { %2818 = vrcp.f32 %v2308_v60 }
 0x950   :  { %v2494_v58 = vpop.permute.xlu1 %2493 }
 0x951   :  { %v2509_v53 = vrot.slane %v2494_v58, %v4215_v49 }
 0x953   :  { %v2515_v1 = vsel %vm302_vm2, %v2509_v53, %v2514_v28 }
 0x957   :  { %v2819_v7 = vpop.eup %2818 }
 0x958   :  { %v2310_v9 = vmul.f32 %v2819_v7, %v2815_v22 }
 0x95a   :  { %v2318_v26 = vmul.f32 %v4060_v55, %v2310_v9  ;;  %v2311_v18 = vmul.f32 1.442695, %v2310_v9  ;;  %v2513_v55 = vrot.slane %v2497_v39, %v4215_v49 }
 0x95c   :  { %v2319_v10 = vsel %vm2299_vm10, %v2318_v26, 0.0  ;;  %2820 = vpow2.f32 %v2311_v18  ;;  %v2516_v51 = vsel %vm304_vm3, %v2513_v55, %v2515_v1 }
 0x95d   :  { %2320 = vadd.xlane.f32.xlu1 %v2319_v10  ;;  %v2518_v38 = vsel %vm661_vm6, %v2516_v51, 0.0 }
 0x966   :  { %v2821_v6 = vpop.eup %2820 }
 0x967   :  { %v2313_v31 = vsel %vm2299_vm10, %v2821_v6, 0.0 }
 0x968   :  { %2314 = vadd.xlane.f32.xlu0 %v2313_v31 }
 0x96c   :  { %2519 = vadd.xlane.f32.xlu0 %v2518_v38 }
 0x970   :  { %663 = vadd.xlane.f32.xlu0 %v662_v4 }
 0x986   :  { %2532 = vrot.lane.b32.xlu0 %v2310_v9, %s2947_s1 }
 0x9ea   :  { %v2321_v45 = vpop.xlane.xlu1 %2320 }
 0x9f5   :  { %v2315_v17 = vpop.xlane.xlu0 %2314 }
 0x9f6   :  { %2822 = vlog2.f32 %v2315_v17 }
 0x9f9   :  { %v2520_v40 = vpop.xlane.xlu0 %2519 }
 0x9fa   :  { %v2521_v2 = vmul.f32 0.2, %v2520_v40 }
 0x9fc   :  { %v2522_v49 = vsel %vm2323_vm11, %v2521_v2, 0.0 }
 0x9fd   :  { %v2523_v25 = vrot.slane %v2522_v49, 4  ;;  %v664_v43 = vpop.xlane.xlu0 %663 }
 0x9fe   :  { %v666_v0 = vmul.f32 0.2, %v664_v43 }
 0x9ff   :  { %v2524_v63 = vadd.f32 %v2523_v25, %v2522_v49 }
 0xa00   :  { %v2823_v34 = vpop.eup %2822 }
 0xa01   :  { %v2317_v32 = vmul.f32 0.6931472, %v2823_v34  ;;  %v2525_v13 = vrot.slane %v2524_v63, 2  ;;  %v2533_v20 = vpop.permute.xlu0 %2532 }
 0xa02   :  { %v2535_v14 = vsel %vm2293_vm9, %v666_v0, %v2533_v20 }
 0xa03   :  { %v2322_v47 = vsub.f32 %v2317_v32, %v2321_v45  ;;  %v2526_v57 = vadd.f32 %v2525_v13, %v2524_v63 }
 0xa05   :  { %v2324_v3 = vsel %vm2323_vm11, %v2322_v47, 0.0  ;;  %v2527_v21 = vrot.slane %v2526_v57, 1 }
 0xa06   :  { %v2325_v15 = vrot.slane %v2324_v3, 4 }
 0xa07   :  { %v2528_v30 = vadd.f32 %v2527_v21, %v2526_v57 }
 0xa08   :  { %v2326_v50 = vadd.f32 %v2325_v15, %v2324_v3 }
 0xa09   :  { %v2529_v44 = vmul.f32 0.25, %v2528_v30 }
 0xa0a   :  { %v2327_v5 = vrot.slane %v2326_v50, 2 }
 0xa0c   :  { %v2328_v42 = vadd.f32 %v2327_v5, %v2326_v50 }
 0xa0e   :  { %v2329_v41 = vrot.slane %v2328_v42, 1 }
 0xa10   :  { %v2330_v11 = vadd.f32 %v2329_v41, %v2328_v42 }
 0xa12   :  { %v2332_v61 = vmul.f32 0.25, %v2330_v11 }
 0xa14   :  { %v2530_v37 = vadd.f32 %v2529_v44, %v2332_v61 }
 0xa16   :  { %v2537_v24 = vsel %vm2536_vm12, %v2535_v14, %v2530_v37 }
 0xa17   :  { %v2539_v52 = vsel %vm2538_vm13, %v2537_v24, 0.0 }
 0xa18   :  { %2540 = vst [vmem:[%s4120_s5] sm:$0xf] %v2539_v52 }
 0xa19   :  { %2545 = vsyncpa [#allocation3], 1 }
 0xa1a   :  { %2546 = vsyncpa [#allocation5], 1 }
 0xa1b   :  { %2547 = vsyncpa [#allocation8], 1 }

</bundles_post_ra>
